<compile_context>
chip_gen: v7x
topology: tpu7x:2x2x1
jax: 0.10.0
libtpu: 0.0.40
codegen_flags: <defaults>
</compile_context>

<pallas_src>
import functools
import math

import jax
import jax.numpy as jnp
from jax import lax
from jax.experimental import pallas as pl
from jax.experimental.pallas import tpu as pltpu


# ----------------------------------------------------------------------------
# helpers
# ----------------------------------------------------------------------------
def _pick_tile(dim: int, target: int, align: int) -> int:
    """Largest `align`-multiple divisor of `dim` that is <= target, else the full dim."""
    if dim <= target:
        return dim
    t = (target // align) * align
    while t >= align:
        if dim % t == 0:
            return t
        t -= align
    return dim


def _pad_rows(x, mult):
    """Pad the leading (row) dim up to a multiple of `mult` (no-op if already aligned)."""
    m = x.shape[0]
    rem = (-m) % mult
    if rem:
        x = jnp.pad(x, ((0, rem),) + ((0, 0),) * (x.ndim - 1))
    return x, m


def _apply_epilogue(y, activation):
    if activation == "gelu":
        # exact (erf) GELU, matching torch.nn.GELU default
        y = 0.5 * y * (1.0 + lax.erf(y * 0.7071067811865476))
    return y


# ----------------------------------------------------------------------------
# Fused LayerNorm + Linear kernel (single full-K block)
# ----------------------------------------------------------------------------
def _ln_linear_kernel(x_ref, g_ref, b_ref, w_ref, bias_ref, o_ref, *, eps, activation):
    x = x_ref[...].astype(jnp.float32)                      # (tm, C)
    mu = jnp.mean(x, axis=-1, keepdims=True)
    xc = x - mu
    var = jnp.mean(xc * xc, axis=-1, keepdims=True)
    h = xc * lax.rsqrt(var + eps)
    h = h * g_ref[...].astype(jnp.float32) + b_ref[...].astype(jnp.float32)
    w = w_ref[...].reshape(w_ref.shape[-2], w_ref.shape[-1]).astype(jnp.float32)
    y = jnp.dot(h, w, preferred_element_type=jnp.float32)   # MXU, f32 accumulate
    y = y + bias_ref[...].reshape(1, -1).astype(jnp.float32)
    y = _apply_epilogue(y, activation)
    o_ref[...] = y.reshape(o_ref.shape).astype(o_ref.dtype)


def ln_linear(x, gamma, beta, w, b, *, activation=None, eps=1e-5, tm=256, tn=512):
    """y = LayerNorm(x) @ w + b  (LN fused into the GEMM prologue; optional GELU)."""
    M_in, C = x.shape
    _, F = w.shape
    x, _ = _pad_rows(x, 8)
    M = x.shape[0]
    tm = _pick_tile(M, tm, 8)
    tn = _pick_tile(F, tn, 128)
    ce = pl.CostEstimate(
        flops=2 * M * C * F + 8 * M * C,
        transcendentals=(M * F if activation == "gelu" else 0),
        bytes_accessed=4 * (M * C + C * F + M * F))
    out = pl.pallas_call(
        functools.partial(_ln_linear_kernel, eps=eps, activation=activation),
        out_shape=jax.ShapeDtypeStruct((M, F), x.dtype),
        grid=(M // tm, F // tn),                 # j innermost -> x block stays resident
        in_specs=[
            pl.BlockSpec((tm, C), lambda i, j: (i, 0)),
            pl.BlockSpec((1, C), lambda i, j: (0, 0)),
            pl.BlockSpec((1, C), lambda i, j: (0, 0)),
            pl.BlockSpec((C, tn), lambda i, j: (0, j)),
            pl.BlockSpec((1, tn), lambda i, j: (0, j)),
        ],
        out_specs=pl.BlockSpec((tm, tn), lambda i, j: (i, j)),
        compiler_params=pltpu.CompilerParams(
            dimension_semantics=("parallel", "parallel")),
        cost_estimate=ce,
    )(x, gamma.reshape(1, C), beta.reshape(1, C), w, b.reshape(1, F))
    return out[:M_in] if M_in != M else out


def ln_linear_qkv(x, gamma, beta, w3, b3, *, eps=1e-5, tm=256, tn=512):
    """Fused LayerNorm + Q/K/V projection.

    w3: (3, C, C) stacked [wq, wk, wv]; b3: (3, 1, C).  Output is (3, M, C) with
    q/k/v separated on the leading axis so the attention kernel can address them
    (and per-batch / per-row-tile windows) with BlockSpec index maps alone.
    """
    M_in, C = x.shape
    x, _ = _pad_rows(x, 8)
    M = x.shape[0]
    tm = _pick_tile(M, tm, 8)
    tn = _pick_tile(C, tn, 128)
    ce = pl.CostEstimate(
        flops=6 * M * C * C + 8 * M * C,
        transcendentals=0,
        bytes_accessed=4 * (M * C + 3 * C * C + 3 * M * C))
    out = pl.pallas_call(
        functools.partial(_ln_linear_kernel, eps=eps, activation=None),
        out_shape=jax.ShapeDtypeStruct((3, M, C), x.dtype),
        # grid = (rows, qkv-selector, cols): the x block index is constant over
        # (s, j), so the normalized row tile is fetched from HBM only once.
        grid=(M // tm, 3, C // tn),
        in_specs=[
            pl.BlockSpec((tm, C), lambda i, s, j: (i, 0)),
            pl.BlockSpec((1, C), lambda i, s, j: (0, 0)),
            pl.BlockSpec((1, C), lambda i, s, j: (0, 0)),
            pl.BlockSpec((1, C, tn), lambda i, s, j: (s, 0, j)),
            pl.BlockSpec((1, 1, tn), lambda i, s, j: (s, 0, j)),
        ],
        out_specs=pl.BlockSpec((1, tm, tn), lambda i, s, j: (s, i, j)),
        compiler_params=pltpu.CompilerParams(
            dimension_semantics=("parallel", "parallel", "parallel")),
        cost_estimate=ce,
    )(x, gamma.reshape(1, C), beta.reshape(1, C), w3, b3)
    if M_in != M:
        out = out[:, :M_in, :]
    return out


# ----------------------------------------------------------------------------
# K-tiled Linear (+ bias + fused residual add)
# ----------------------------------------------------------------------------
def _linear_residual_kernel(x_ref, w_ref, b_ref, r_ref, o_ref, acc_ref, *, activation):
    k = pl.program_id(2)

    @pl.when(k == 0)
    def _init():
        acc_ref[...] = jnp.zeros_like(acc_ref)

    acc_ref[...] += jnp.dot(x_ref[...], w_ref[...], preferred_element_type=jnp.float32)

    @pl.when(k == pl.num_programs(2) - 1)
    def _fin():
        y = acc_ref[...] + b_ref[...].astype(jnp.float32)
        y = _apply_epilogue(y, activation) + r_ref[...].astype(jnp.float32)
        o_ref[...] = y.astype(o_ref.dtype)


def linear_residual(x, w, b, residual, *, activation=None, tm=256, tn=512, tk=512):
    """y = residual + epilogue(x @ w + b)."""
    M_in, K = x.shape
    _, N = w.shape
    x, _ = _pad_rows(x, 8)
    residual, _ = _pad_rows(residual, 8)
    M = x.shape[0]
    tm = _pick_tile(M, tm, 8)
    tn = _pick_tile(N, tn, 128)
    tk = _pick_tile(K, tk, 128)
    ce = pl.CostEstimate(
        flops=2 * M * N * K,
        transcendentals=(M * N if activation == "gelu" else 0),
        bytes_accessed=4 * (M * K + K * N + 2 * M * N))
    out = pl.pallas_call(
        functools.partial(_linear_residual_kernel, activation=activation),
        out_shape=jax.ShapeDtypeStruct((M, N), x.dtype),
        grid=(M // tm, N // tn, K // tk),
        in_specs=[
            pl.BlockSpec((tm, tk), lambda i, j, k: (i, k)),
            pl.BlockSpec((tk, tn), lambda i, j, k: (k, j)),
            # bias / residual block indices are constant over k -> fetched once
            # per output tile (not per reduction step).  On v7x (64 MiB VMEM)
            # shrink tn before tm if these resident blocks make VMEM tight.
            pl.BlockSpec((1, tn), lambda i, j, k: (0, j)),
            pl.BlockSpec((tm, tn), lambda i, j, k: (i, j)),
        ],
        out_specs=pl.BlockSpec((tm, tn), lambda i, j, k: (i, j)),
        scratch_shapes=[pltpu.VMEM((tm, tn), jnp.float32)],
        compiler_params=pltpu.CompilerParams(
            dimension_semantics=("parallel", "parallel", "arbitrary")),
        cost_estimate=ce,
    )(x, w, b.reshape(1, N), residual)
    return out[:M_in] if M_in != M else out


# ----------------------------------------------------------------------------
# Attention kernel: one (batch, q-row-tile) step, all heads processed in-kernel
# ----------------------------------------------------------------------------
def _attention_kernel(q_ref, k_ref, v_ref, o_ref, *, num_heads, scale):
    C = q_ref.shape[-1]
    D = C // num_heads
    # (tq, C) / (N, C) f32 tiles; scale folded into q: O(tq*C) instead of O(tq*N)
    q = q_ref[...].reshape(q_ref.shape[-2], C).astype(jnp.float32) * scale
    k = k_ref[...].reshape(k_ref.shape[-2], C).astype(jnp.float32)
    v = v_ref[...].reshape(v_ref.shape[-2], C).astype(jnp.float32)
    outs = []
    for h in range(num_heads):                      # static unroll over heads
        cs = slice(h * D, (h + 1) * D)
        qh, kh, vh = q[:, cs], k[:, cs], v[:, cs]
        # contract last dims directly (no explicit .T -> no XLU transpose of K)
        s = lax.dot_general(qh, kh, (((1,), (1,)), ((), ())),
                            preferred_element_type=jnp.float32)       # (tq, N)
        m = jnp.max(s, axis=-1, keepdims=True)
        p = jnp.exp(s - m)
        l = jnp.sum(p, axis=-1, keepdims=True)
        o = jnp.dot(p, vh, preferred_element_type=jnp.float32)        # (tq, D)
        # normalize after PV: O(tq*D) muls, reciprocal on the EUP slot
        outs.append(o * pl.reciprocal(l, approx=True))
    y = jnp.concatenate(outs, axis=-1)              # (tq, C) lane-dense store
    o_ref[...] = y.reshape(o_ref.shape).astype(o_ref.dtype)


def attention(qkv, *, num_heads, scale, tq=256):
    """qkv: (3, B, N, C) with [q, k, v] stacked on the leading axis."""
    _, B, N, C = qkv.shape
    tq = _pick_tile(N, tq, 8)   # q-row tiling bounds score VMEM to O(tq * N)
    # TODO(synk): for very long sequences add a KV-block grid axis with online
    # (flash-style) softmax; q-row tiling already bounds VMEM for typical N.
    ce = pl.CostEstimate(
        flops=4 * B * N * N * C,
        transcendentals=B * num_heads * N * N,
        bytes_accessed=4 * (3 * B * N * C + B * N * C))
    qspec = pl.BlockSpec((1, 1, tq, C), lambda b, i: (0, b, i, 0))
    kspec = pl.BlockSpec((1, 1, N, C), lambda b, i: (1, b, 0, 0))   # resident over i
    vspec = pl.BlockSpec((1, 1, N, C), lambda b, i: (2, b, 0, 0))   # resident over i
    return pl.pallas_call(
        functools.partial(_attention_kernel, num_heads=num_heads, scale=scale),
        out_shape=jax.ShapeDtypeStruct((B, N, C), qkv.dtype),
        grid=(B, N // tq),
        in_specs=[qspec, kspec, vspec],
        out_specs=pl.BlockSpec((1, tq, C), lambda b, i: (b, i, 0)),
        compiler_params=pltpu.CompilerParams(
            dimension_semantics=("parallel", "parallel")),
        cost_estimate=ce,
    )(qkv, qkv, qkv)


# ----------------------------------------------------------------------------
# Full transformer-block forward (Pallas-composed)
# ----------------------------------------------------------------------------
@functools.partial(jax.jit, static_argnames=("num_heads",))
def transformer_block_forward(x, params, *, num_heads):
    B, N, C = x.shape
    D = C // num_heads
    x2 = x.reshape(B * N, C)

    # ---- attention branch: x = x + proj(attn(LN(x))) ----
    # one fused LN + QKV GEMM -> (3, B*N, C); only free reshapes afterwards.
    qkv = ln_linear_qkv(x2, params["ln1_g"], params["ln1_b"],
                        params["wqkv3"], params["bqkv3"])
    qkv = qkv.reshape(3, B, N, C)

    a = attention(qkv, num_heads=num_heads, scale=float(D) ** -0.5)   # (B, N, C)
    a2 = a.reshape(B * N, C)

    # TODO(synk): attn_drop / proj_drop / mlp dropout are identity (inference mode).
    x2 = linear_residual(a2, params["wproj"], params["bproj"], x2)

    # ---- MLP branch: x = x + W2(GELU(W1(LN(x)))) ----
    m1 = ln_linear(x2, params["ln2_g"], params["ln2_b"],
                   params["w1"], params["b1"], activation="gelu")
    x2 = linear_residual(m1, params["w2"], params["b2"], x2)

    return x2.reshape(B, N, C)


class MyTransformerBlock:
    """Pallas mirror of the PyTorch `myTransformerBlock` (inference; sr_ratio == 1)."""

    def __init__(self, d_model, d_k, d_v, h, block_exp, attn_pdrop, resid_pdrop,
                 sr_ratio, params):
        # TODO(synk): sr_ratio > 1 Conv2d spatial-reduction branch of SelfAttention
        # is not implemented (not used for sr_ratio == 1).
        assert sr_ratio == 1, "sr_ratio > 1 path not implemented"
        assert d_model % h == 0
        self.num_heads = h
        C = d_model
        p = dict(params)
        # Fuse q + kv projections into one GEMM (done once, host/device side):
        # stack as (3, C, C) weights and (3, 1, C) biases -> [q, k, v].
        p["wqkv3"] = jnp.stack([p["wq"], p["wkv"][:, :C], p["wkv"][:, C:]], axis=0)
        p["bqkv3"] = jnp.stack([p["bq"], p["bkv"][:C], p["bkv"][C:]], axis=0).reshape(3, 1, C)
        self.params = p

    def __call__(self, x):
        return transformer_block_forward(x, self.params, num_heads=self.num_heads)


# ----------------------------------------------------------------------------
# Pure-JAX reference + demo
# ----------------------------------------------------------------------------
def ref_forward(x, params, *, num_heads):
    B, N, C = x.shape
    H, D = num_heads, C // num_heads

    def ln(z, g, b):
        mu = jnp.mean(z, -1, keepdims=True)
        var = jnp.mean((z - mu) ** 2, -1, keepdims=True)
        return (z - mu) / jnp.sqrt(var + 1e-5) * g + b

    h1 = ln(x, params["ln1_g"], params["ln1_b"])
    q = h1 @ params["wq"] + params["bq"]
    kv = h1 @ params["wkv"] + params["bkv"]
    q = q.reshape(B, N, H, D).transpose(0, 2, 1, 3)
    kv = kv.reshape(B, N, 2, H, D).transpose(2, 0, 3, 1, 4)
    k, v = kv[0], kv[1]
    attn = (q @ jnp.swapaxes(k, -1, -2)) * (float(D) ** -0.5)
    attn = jax.nn.softmax(attn, axis=-1)
    o = (attn @ v).transpose(0, 2, 1, 3).reshape(B, N, C)
    x = x + (o @ params["wproj"] + params["bproj"])
    h2 = ln(x, params["ln2_g"], params["ln2_b"])
    m = jax.nn.gelu(h2 @ params["w1"] + params["b1"], approximate=False)
    return x + (m @ params["w2"] + params["b2"])


def init_params(key, d_model, block_exp, dtype=jnp.float32):
    d_ff = block_exp * d_model
    ks = jax.random.split(key, 10)
    std = 0.02
    n = lambda k, s: (std * jax.random.normal(k, s)).astype(dtype)
    return {
        "ln1_g": jnp.ones((d_model,), dtype), "ln1_b": jnp.zeros((d_model,), dtype),
        "ln2_g": jnp.ones((d_model,), dtype), "ln2_b": jnp.zeros((d_model,), dtype),
        "wq": n(ks[0], (d_model, d_model)),     "bq": n(ks[1], (d_model,)),
        "wkv": n(ks[2], (d_model, 2 * d_model)), "bkv": n(ks[3], (2 * d_model,)),
        "wproj": n(ks[4], (d_model, d_model)),  "bproj": n(ks[5], (d_model,)),
        "w1": n(ks[6], (d_model, d_ff)),        "b1": n(ks[7], (d_ff,)),
        "w2": n(ks[8], (d_ff, d_model)),        "b2": n(ks[9], (d_model,)),
    }


if __name__ == "__main__":
    B, N, C = 2, 8, 32          # batch=2, seq=8, hidden=32
    H, block_exp = 4, 4

    key = jax.random.PRNGKey(0)
    kx, kp = jax.random.split(key)
    x = jax.random.normal(kx, (B, N, C), dtype=jnp.float32)
    params = init_params(kp, C, block_exp)

    block = MyTransformerBlock(d_model=C, d_k=C, d_v=C, h=H, block_exp=block_exp,
                               attn_pdrop=0.1, resid_pdrop=0.1, sr_ratio=1,
                               params=params)
    out = jax.block_until_ready(block(x))

    ref = jax.block_until_ready(ref_forward(x, params, num_heads=H))
    assert out.shape == (B, N, C)
    err = float(jnp.max(jnp.abs(out - ref)))
    assert jnp.allclose(out, ref, atol=1e-3, rtol=1e-3), f"max abs err = {err}"

    print("KERNEL_OK")
</pallas_src>

<mosaic_0001>
module attributes {stable_mosaic.version = 11 : i64} {
  func.func @_linear_residual_kernel(%arg0: i32, %arg1: i32, %arg2: i32, %arg3: memref<16x32xf32, #tpu.memory_space<vmem>>, %arg4: memref<32x32xf32, #tpu.memory_space<vmem>>, %arg5: memref<1x32xf32, #tpu.memory_space<vmem>>, %arg6: memref<16x32xf32, #tpu.memory_space<vmem>>, %arg7: memref<16x32xf32, #tpu.memory_space<vmem>>, %arg8: memref<16x32xf32, #tpu.memory_space<vmem>>) attributes {dimension_semantics = [#tpu.dimension_semantics<parallel>, #tpu.dimension_semantics<parallel>, #tpu.dimension_semantics<arbitrary>], iteration_bounds = array<i64: 1, 1, 1>, scalar_prefetch = 0 : i64, scratch_operands = 1 : i64, tpu.core_type = #tpu.core_type<tc>, window_params = [{transform_indices = @transform_0, window_bounds = array<i64: 16, 32>}, {transform_indices = @transform_1, window_bounds = array<i64: 32, 32>}, {transform_indices = @transform_2, window_bounds = array<i64: 1, 32>}, {transform_indices = @transform_3, window_bounds = array<i64: 16, 32>}, {transform_indices = @transform_4, window_bounds = array<i64: 16, 32>}]} {
    %c0_i32 = arith.constant 0 : i32
    %0 = arith.cmpi eq, %arg2, %c0_i32 : i32
    %1 = arith.extui %0 : i1 to i32
    %c0_i32_0 = arith.constant 0 : i32
    %2 = arith.cmpi ne, %1, %c0_i32_0 : i32
    scf.if %2 {
      %cst_10 = arith.constant 0.000000e+00 : f32
      %12 = vector.broadcast %cst_10 : f32 to vector<16x32xf32>
      %c0_11 = arith.constant 0 : index
      %c0_12 = arith.constant 0 : index
      %13 = vector.load %arg8[%c0_11, %c0_12] : memref<16x32xf32, #tpu.memory_space<vmem>>, vector<16x32xf32>
      tpu.vector_store %arg8[%c0_11, %c0_12], %12 {strides = array<i32>} : memref<16x32xf32, #tpu.memory_space<vmem>>, vector<16x32xf32>,
    } else {
    }
    %c0 = arith.constant 0 : index
    %c0_1 = arith.constant 0 : index
    %3 = vector.load %arg8[%c0, %c0_1] : memref<16x32xf32, #tpu.memory_space<vmem>>, vector<16x32xf32>
    %c0_2 = arith.constant 0 : index
    %c0_3 = arith.constant 0 : index
    %4 = vector.load %arg3[%c0_2, %c0_3] : memref<16x32xf32, #tpu.memory_space<vmem>>, vector<16x32xf32>
    %c0_4 = arith.constant 0 : index
    %c0_5 = arith.constant 0 : index
    %5 = vector.load %arg4[%c0_4, %c0_5] : memref<32x32xf32, #tpu.memory_space<vmem>>, vector<32x32xf32>
    %cst = arith.constant dense<0.000000e+00> : vector<16x32xf32>
    %6 = tpu.matmul %4, %5, %cst {dimension_numbers = #tpu.dot_dimension_numbers<[1], [0], [0], [1], [0, 0, 1, 1], [], []>} : vector<16x32xf32>, vector<32x32xf32>, vector<16x32xf32> -> vector<16x32xf32>
    %7 = arith.addf %3, %6 : vector<16x32xf32>
    %c0_6 = arith.constant 0 : index
    %c0_7 = arith.constant 0 : index
    %8 = vector.load %arg8[%c0_6, %c0_7] : memref<16x32xf32, #tpu.memory_space<vmem>>, vector<16x32xf32>
    tpu.vector_store %arg8[%c0_6, %c0_7], %7 {strides = array<i32>} : memref<16x32xf32, #tpu.memory_space<vmem>>, vector<16x32xf32>,
    %c0_i32_8 = arith.constant 0 : i32
    %9 = arith.cmpi eq, %arg2, %c0_i32_8 : i32
    %10 = arith.extui %9 : i1 to i32
    %c0_i32_9 = arith.constant 0 : i32
    %11 = arith.cmpi ne, %10, %c0_i32_9 : i32
    scf.if %11 {
      %c0_10 = arith.constant 0 : index
      %c0_11 = arith.constant 0 : index
      %12 = vector.load %arg8[%c0_10, %c0_11] : memref<16x32xf32, #tpu.memory_space<vmem>>, vector<16x32xf32>
      %c0_12 = arith.constant 0 : index
      %c0_13 = arith.constant 0 : index
      %13 = vector.load %arg5[%c0_12, %c0_13] : memref<1x32xf32, #tpu.memory_space<vmem>>, vector<1x32xf32>
      %14 = vector.broadcast %13 : vector<1x32xf32> to vector<16x32xf32>
      %15 = arith.addf %12, %14 : vector<16x32xf32>
      %c0_14 = arith.constant 0 : index
      %c0_15 = arith.constant 0 : index
      %16 = vector.load %arg6[%c0_14, %c0_15] : memref<16x32xf32, #tpu.memory_space<vmem>>, vector<16x32xf32>
      %17 = arith.addf %15, %16 : vector<16x32xf32>
      %c0_16 = arith.constant 0 : index
      %c0_17 = arith.constant 0 : index
      %18 = vector.load %arg7[%c0_16, %c0_17] : memref<16x32xf32, #tpu.memory_space<vmem>>, vector<16x32xf32>
      tpu.vector_store %arg7[%c0_16, %c0_17], %17 {strides = array<i32>} : memref<16x32xf32, #tpu.memory_space<vmem>>, vector<16x32xf32>,
    } else {
    }
    return
  }
  func.func @transform_0(%arg0: i32, %arg1: i32, %arg2: i32) -> (i32, i32) {
    %c0_i32 = arith.constant 0 : i32
    return %arg0, %arg2 : i32, i32
  }
  func.func @transform_1(%arg0: i32, %arg1: i32, %arg2: i32) -> (i32, i32) {
    %c0_i32 = arith.constant 0 : i32
    return %arg2, %arg1 : i32, i32
  }
  func.func @transform_2(%arg0: i32, %arg1: i32, %arg2: i32) -> (i32, i32) {
    %c0_i32 = arith.constant 0 : i32
    %c0_i32_0 = arith.constant 0 : i32
    return %c0_i32, %arg1 : i32, i32
  }
  func.func @transform_3(%arg0: i32, %arg1: i32, %arg2: i32) -> (i32, i32) {
    %c0_i32 = arith.constant 0 : i32
    return %arg0, %arg1 : i32, i32
  }
  func.func @transform_4(%arg0: i32, %arg1: i32, %arg2: i32) -> (i32, i32) {
    %c0_i32 = arith.constant 0 : i32
    return %arg0, %arg1 : i32, i32
  }
}

module attributes {stable_mosaic.version = 11 : i64} {
  func.func @_ln_linear_kernel(%arg0: i32, %arg1: i32, %arg2: i32, %arg3: memref<16x32xf32, #tpu.memory_space<vmem>>, %arg4: memref<1x32xf32, #tpu.memory_space<vmem>>, %arg5: memref<1x32xf32, #tpu.memory_space<vmem>>, %arg6: memref<1x32x32xf32, #tpu.memory_space<vmem>>, %arg7: memref<1x1x32xf32, #tpu.memory_space<vmem>>, %arg8: memref<1x16x32xf32, #tpu.memory_space<vmem>>) attributes {dimension_semantics = [#tpu.dimension_semantics<parallel>, #tpu.dimension_semantics<parallel>, #tpu.dimension_semantics<parallel>], iteration_bounds = array<i64: 1, 3, 1>, scalar_prefetch = 0 : i64, scratch_operands = 0 : i64, tpu.core_type = #tpu.core_type<tc>, window_params = [{transform_indices = @transform_0, window_bounds = array<i64: 16, 32>}, {pipeline_mode = #tpu.pipeline_mode<synchronous>, transform_indices = @transform_1, window_bounds = array<i64: 1, 32>}, {pipeline_mode = #tpu.pipeline_mode<synchronous>, transform_indices = @transform_2, window_bounds = array<i64: 1, 32>}, {transform_indices = @transform_3, window_bounds = array<i64: 1, 32, 32>}, {transform_indices = @transform_4, window_bounds = array<i64: 1, 1, 32>}, {transform_indices = @transform_5, window_bounds = array<i64: 1, 16, 32>}]} {
    %c0 = arith.constant 0 : index
    %c0_0 = arith.constant 0 : index
    %0 = vector.load %arg3[%c0, %c0_0] : memref<16x32xf32, #tpu.memory_space<vmem>>, vector<16x32xf32>
    %cst = arith.constant dense<0.000000e+00> : vector<16xf32>
    %1 = vector.multi_reduction <add>, %0, %cst [1] : vector<16x32xf32> to vector<16xf32>
    %2 = vector.shape_cast %1 : vector<16xf32> to vector<16x1xf32>
    %cst_1 = arith.constant 3.200000e+01 : f32
    %3 = vector.broadcast %cst_1 : f32 to vector<16x1xf32>
    %4 = arith.divf %2, %3 : vector<16x1xf32>
    %5 = vector.broadcast %4 : vector<16x1xf32> to vector<16x32xf32>
    %6 = arith.subf %0, %5 : vector<16x32xf32>
    %7 = arith.mulf %6, %6 : vector<16x32xf32>
    %cst_2 = arith.constant dense<0.000000e+00> : vector<16xf32>
    %8 = vector.multi_reduction <add>, %7, %cst_2 [1] : vector<16x32xf32> to vector<16xf32>
    %9 = vector.shape_cast %8 : vector<16xf32> to vector<16x1xf32>
    %cst_3 = arith.constant 3.200000e+01 : f32
    %10 = vector.broadcast %cst_3 : f32 to vector<16x1xf32>
    %11 = arith.divf %9, %10 : vector<16x1xf32>
    %cst_4 = arith.constant 9.99999974E-6 : f32
    %12 = vector.broadcast %cst_4 : f32 to vector<16x1xf32>
    %13 = arith.addf %11, %12 : vector<16x1xf32>
    %14 = math.rsqrt %13 : vector<16x1xf32>
    %15 = vector.broadcast %14 : vector<16x1xf32> to vector<16x32xf32>
    %16 = arith.mulf %6, %15 : vector<16x32xf32>
    %c0_5 = arith.constant 0 : index
    %c0_6 = arith.constant 0 : index
    %17 = vector.load %arg4[%c0_5, %c0_6] : memref<1x32xf32, #tpu.memory_space<vmem>>, vector<1x32xf32>
    %18 = vector.broadcast %17 : vector<1x32xf32> to vector<16x32xf32>
    %19 = arith.mulf %16, %18 : vector<16x32xf32>
    %c0_7 = arith.constant 0 : index
    %c0_8 = arith.constant 0 : index
    %20 = vector.load %arg5[%c0_7, %c0_8] : memref<1x32xf32, #tpu.memory_space<vmem>>, vector<1x32xf32>
    %21 = vector.broadcast %20 : vector<1x32xf32> to vector<16x32xf32>
    %22 = arith.addf %19, %21 : vector<16x32xf32>
    %c0_9 = arith.constant 0 : index
    %c0_10 = arith.constant 0 : index
    %c0_11 = arith.constant 0 : index
    %23 = vector.load %arg6[%c0_9, %c0_10, %c0_11] : memref<1x32x32xf32, #tpu.memory_space<vmem>>, vector<1x32x32xf32>
    %24 = vector.shape_cast %23 : vector<1x32x32xf32> to vector<32x32xf32>
    %cst_12 = arith.constant dense<0.000000e+00> : vector<16x32xf32>
    %25 = tpu.matmul %22, %24, %cst_12 {dimension_numbers = #tpu.dot_dimension_numbers<[1], [0], [0], [1], [0, 0, 1, 1], [], []>} : vector<16x32xf32>, vector<32x32xf32>, vector<16x32xf32> -> vector<16x32xf32>
    %c0_13 = arith.constant 0 : index
    %c0_14 = arith.constant 0 : index
    %c0_15 = arith.constant 0 : index
    %26 = vector.load %arg7[%c0_13, %c0_14, %c0_15] : memref<1x1x32xf32, #tpu.memory_space<vmem>>, vector<1x1x32xf32>
    %27 = vector.shape_cast %26 : vector<1x1x32xf32> to vector<1x32xf32>
    %28 = vector.broadcast %27 : vector<1x32xf32> to vector<16x32xf32>
    %29 = arith.addf %25, %28 : vector<16x32xf32>
    %30 = vector.shape_cast %29 : vector<16x32xf32> to vector<1x16x32xf32>
    %c0_16 = arith.constant 0 : index
    %c0_17 = arith.constant 0 : index
    %c0_18 = arith.constant 0 : index
    %31 = vector.load %arg8[%c0_16, %c0_17, %c0_18] : memref<1x16x32xf32, #tpu.memory_space<vmem>>, vector<1x16x32xf32>
    tpu.vector_store %arg8[%c0_16, %c0_17, %c0_18], %30 {strides = array<i32>} : memref<1x16x32xf32, #tpu.memory_space<vmem>>, vector<1x16x32xf32>,
    return
  }
  func.func @transform_0(%arg0: i32, %arg1: i32, %arg2: i32) -> (i32, i32) {
    %c0_i32 = arith.constant 0 : i32
    %c0_i32_0 = arith.constant 0 : i32
    return %arg0, %c0_i32 : i32, i32
  }
  func.func @transform_1(%arg0: i32, %arg1: i32, %arg2: i32) -> (i32, i32) {
    %c0_i32 = arith.constant 0 : i32
    %c0_i32_0 = arith.constant 0 : i32
    %c0_i32_1 = arith.constant 0 : i32
    return %c0_i32, %c0_i32_0 : i32, i32
  }
  func.func @transform_2(%arg0: i32, %arg1: i32, %arg2: i32) -> (i32, i32) {
    %c0_i32 = arith.constant 0 : i32
    %c0_i32_0 = arith.constant 0 : i32
    %c0_i32_1 = arith.constant 0 : i32
    return %c0_i32, %c0_i32_0 : i32, i32
  }
  func.func @transform_3(%arg0: i32, %arg1: i32, %arg2: i32) -> (i32, i32, i32) {
    %c0_i32 = arith.constant 0 : i32
    %c0_i32_0 = arith.constant 0 : i32
    return %arg1, %c0_i32, %arg2 : i32, i32, i32
  }
  func.func @transform_4(%arg0: i32, %arg1: i32, %arg2: i32) -> (i32, i32, i32) {
    %c0_i32 = arith.constant 0 : i32
    %c0_i32_0 = arith.constant 0 : i32
    return %arg1, %c0_i32, %arg2 : i32, i32, i32
  }
  func.func @transform_5(%arg0: i32, %arg1: i32, %arg2: i32) -> (i32, i32, i32) {
    %c0_i32 = arith.constant 0 : i32
    return %arg1, %arg0, %arg2 : i32, i32, i32
  }
}

module attributes {stable_mosaic.version = 11 : i64} {
  func.func @_ln_linear_kernel(%arg0: i32, %arg1: i32, %arg2: memref<16x32xf32, #tpu.memory_space<vmem>>, %arg3: memref<1x32xf32, #tpu.memory_space<vmem>>, %arg4: memref<1x32xf32, #tpu.memory_space<vmem>>, %arg5: memref<32x128xf32, #tpu.memory_space<vmem>>, %arg6: memref<1x128xf32, #tpu.memory_space<vmem>>, %arg7: memref<16x128xf32, #tpu.memory_space<vmem>>) attributes {dimension_semantics = [#tpu.dimension_semantics<parallel>, #tpu.dimension_semantics<parallel>], iteration_bounds = array<i64: 1, 1>, scalar_prefetch = 0 : i64, scratch_operands = 0 : i64, tpu.core_type = #tpu.core_type<tc>, window_params = [{transform_indices = @transform_0, window_bounds = array<i64: 16, 32>}, {pipeline_mode = #tpu.pipeline_mode<synchronous>, transform_indices = @transform_1, window_bounds = array<i64: 1, 32>}, {pipeline_mode = #tpu.pipeline_mode<synchronous>, transform_indices = @transform_2, window_bounds = array<i64: 1, 32>}, {transform_indices = @transform_3, window_bounds = array<i64: 32, 128>}, {transform_indices = @transform_4, window_bounds = array<i64: 1, 128>}, {transform_indices = @transform_5, window_bounds = array<i64: 16, 128>}]} {
    %c0 = arith.constant 0 : index
    %c0_0 = arith.constant 0 : index
    %0 = vector.load %arg2[%c0, %c0_0] : memref<16x32xf32, #tpu.memory_space<vmem>>, vector<16x32xf32>
    %cst = arith.constant dense<0.000000e+00> : vector<16xf32>
    %1 = vector.multi_reduction <add>, %0, %cst [1] : vector<16x32xf32> to vector<16xf32>
    %2 = vector.shape_cast %1 : vector<16xf32> to vector<16x1xf32>
    %cst_1 = arith.constant 3.200000e+01 : f32
    %3 = vector.broadcast %cst_1 : f32 to vector<16x1xf32>
    %4 = arith.divf %2, %3 : vector<16x1xf32>
    %5 = vector.broadcast %4 : vector<16x1xf32> to vector<16x32xf32>
    %6 = arith.subf %0, %5 : vector<16x32xf32>
    %7 = arith.mulf %6, %6 : vector<16x32xf32>
    %cst_2 = arith.constant dense<0.000000e+00> : vector<16xf32>
    %8 = vector.multi_reduction <add>, %7, %cst_2 [1] : vector<16x32xf32> to vector<16xf32>
    %9 = vector.shape_cast %8 : vector<16xf32> to vector<16x1xf32>
    %cst_3 = arith.constant 3.200000e+01 : f32
    %10 = vector.broadcast %cst_3 : f32 to vector<16x1xf32>
    %11 = arith.divf %9, %10 : vector<16x1xf32>
    %cst_4 = arith.constant 9.99999974E-6 : f32
    %12 = vector.broadcast %cst_4 : f32 to vector<16x1xf32>
    %13 = arith.addf %11, %12 : vector<16x1xf32>
    %14 = math.rsqrt %13 : vector<16x1xf32>
    %15 = vector.broadcast %14 : vector<16x1xf32> to vector<16x32xf32>
    %16 = arith.mulf %6, %15 : vector<16x32xf32>
    %c0_5 = arith.constant 0 : index
    %c0_6 = arith.constant 0 : index
    %17 = vector.load %arg3[%c0_5, %c0_6] : memref<1x32xf32, #tpu.memory_space<vmem>>, vector<1x32xf32>
    %18 = vector.broadcast %17 : vector<1x32xf32> to vector<16x32xf32>
    %19 = arith.mulf %16, %18 : vector<16x32xf32>
    %c0_7 = arith.constant 0 : index
    %c0_8 = arith.constant 0 : index
    %20 = vector.load %arg4[%c0_7, %c0_8] : memref<1x32xf32, #tpu.memory_space<vmem>>, vector<1x32xf32>
    %21 = vector.broadcast %20 : vector<1x32xf32> to vector<16x32xf32>
    %22 = arith.addf %19, %21 : vector<16x32xf32>
    %c0_9 = arith.constant 0 : index
    %c0_10 = arith.constant 0 : index
    %23 = vector.load %arg5[%c0_9, %c0_10] : memref<32x128xf32, #tpu.memory_space<vmem>>, vector<32x128xf32>
    %cst_11 = arith.constant dense<0.000000e+00> : vector<16x128xf32>
    %24 = tpu.matmul %22, %23, %cst_11 {dimension_numbers = #tpu.dot_dimension_numbers<[1], [0], [0], [1], [0, 0, 1, 1], [], []>} : vector<16x32xf32>, vector<32x128xf32>, vector<16x128xf32> -> vector<16x128xf32>
    %c0_12 = arith.constant 0 : index
    %c0_13 = arith.constant 0 : index
    %25 = vector.load %arg6[%c0_12, %c0_13] : memref<1x128xf32, #tpu.memory_space<vmem>>, vector<1x128xf32>
    %26 = vector.broadcast %25 : vector<1x128xf32> to vector<16x128xf32>
    %27 = arith.addf %24, %26 : vector<16x128xf32>
    %cst_14 = arith.constant 5.000000e-01 : f32
    %28 = vector.broadcast %cst_14 : f32 to vector<16x128xf32>
    %29 = arith.mulf %28, %27 : vector<16x128xf32>
    %cst_15 = arith.constant 0.707106769 : f32
    %30 = vector.broadcast %cst_15 : f32 to vector<16x128xf32>
    %31 = arith.mulf %27, %30 : vector<16x128xf32>
    %32 = math.erf %31 : vector<16x128xf32>
    %cst_16 = arith.constant 1.000000e+00 : f32
    %33 = vector.broadcast %cst_16 : f32 to vector<16x128xf32>
    %34 = arith.addf %33, %32 : vector<16x128xf32>
    %35 = arith.mulf %29, %34 : vector<16x128xf32>
    %c0_17 = arith.constant 0 : index
    %c0_18 = arith.constant 0 : index
    %36 = vector.load %arg7[%c0_17, %c0_18] : memref<16x128xf32, #tpu.memory_space<vmem>>, vector<16x128xf32>
    tpu.vector_store %arg7[%c0_17, %c0_18], %35 {strides = array<i32>} : memref<16x128xf32, #tpu.memory_space<vmem>>, vector<16x128xf32>,
    return
  }
  func.func @transform_0(%arg0: i32, %arg1: i32) -> (i32, i32) {
    %c0_i32 = arith.constant 0 : i32
    %c0_i32_0 = arith.constant 0 : i32
    return %arg0, %c0_i32 : i32, i32
  }
  func.func @transform_1(%arg0: i32, %arg1: i32) -> (i32, i32) {
    %c0_i32 = arith.constant 0 : i32
    %c0_i32_0 = arith.constant 0 : i32
    %c0_i32_1 = arith.constant 0 : i32
    return %c0_i32, %c0_i32_0 : i32, i32
  }
  func.func @transform_2(%arg0: i32, %arg1: i32) -> (i32, i32) {
    %c0_i32 = arith.constant 0 : i32
    %c0_i32_0 = arith.constant 0 : i32
    %c0_i32_1 = arith.constant 0 : i32
    return %c0_i32, %c0_i32_0 : i32, i32
  }
  func.func @transform_3(%arg0: i32, %arg1: i32) -> (i32, i32) {
    %c0_i32 = arith.constant 0 : i32
    %c0_i32_0 = arith.constant 0 : i32
    return %c0_i32, %arg1 : i32, i32
  }
  func.func @transform_4(%arg0: i32, %arg1: i32) -> (i32, i32) {
    %c0_i32 = arith.constant 0 : i32
    %c0_i32_0 = arith.constant 0 : i32
    return %c0_i32, %arg1 : i32, i32
  }
  func.func @transform_5(%arg0: i32, %arg1: i32) -> (i32, i32) {
    %c0_i32 = arith.constant 0 : i32
    return %arg0, %arg1 : i32, i32
  }
}

module attributes {stable_mosaic.version = 11 : i64} {
  func.func @_attention_kernel(%arg0: i32, %arg1: i32, %arg2: memref<1x1x8x32xf32, #tpu.memory_space<vmem>>, %arg3: memref<1x1x8x32xf32, #tpu.memory_space<vmem>>, %arg4: memref<1x1x8x32xf32, #tpu.memory_space<vmem>>, %arg5: memref<1x8x32xf32, #tpu.memory_space<vmem>>) attributes {dimension_semantics = [#tpu.dimension_semantics<parallel>, #tpu.dimension_semantics<parallel>], iteration_bounds = array<i64: 2, 1>, scalar_prefetch = 0 : i64, scratch_operands = 0 : i64, tpu.core_type = #tpu.core_type<tc>, window_params = [{transform_indices = @transform_0, window_bounds = array<i64: 1, 1, 8, 32>}, {transform_indices = @transform_1, window_bounds = array<i64: 1, 1, 8, 32>}, {transform_indices = @transform_2, window_bounds = array<i64: 1, 1, 8, 32>}, {transform_indices = @transform_3, window_bounds = array<i64: 1, 8, 32>}]} {
    %c0 = arith.constant 0 : index
    %c0_0 = arith.constant 0 : index
    %c0_1 = arith.constant 0 : index
    %c0_2 = arith.constant 0 : index
    %0 = vector.load %arg2[%c0, %c0_0, %c0_1, %c0_2] : memref<1x1x8x32xf32, #tpu.memory_space<vmem>>, vector<1x1x8x32xf32>
    %1 = vector.shape_cast %0 : vector<1x1x8x32xf32> to vector<8x32xf32>
    %cst = arith.constant 0.353553385 : f32
    %2 = vector.broadcast %cst : f32 to vector<8x32xf32>
    %3 = arith.mulf %1, %2 : vector<8x32xf32>
    %c0_3 = arith.constant 0 : index
    %c0_4 = arith.constant 0 : index
    %c0_5 = arith.constant 0 : index
    %c0_6 = arith.constant 0 : index
    %4 = vector.load %arg3[%c0_3, %c0_4, %c0_5, %c0_6] : memref<1x1x8x32xf32, #tpu.memory_space<vmem>>, vector<1x1x8x32xf32>
    %5 = vector.shape_cast %4 : vector<1x1x8x32xf32> to vector<8x32xf32>
    %c0_7 = arith.constant 0 : index
    %c0_8 = arith.constant 0 : index
    %c0_9 = arith.constant 0 : index
    %c0_10 = arith.constant 0 : index
    %6 = vector.load %arg4[%c0_7, %c0_8, %c0_9, %c0_10] : memref<1x1x8x32xf32, #tpu.memory_space<vmem>>, vector<1x1x8x32xf32>
    %7 = vector.shape_cast %6 : vector<1x1x8x32xf32> to vector<8x32xf32>
    %8 = vector.extract_strided_slice %3 {offsets = [0, 0], sizes = [8, 8], strides = [1, 1]} : vector<8x32xf32> to vector<8x8xf32>
    %9 = vector.extract_strided_slice %5 {offsets = [0, 0], sizes = [8, 8], strides = [1, 1]} : vector<8x32xf32> to vector<8x8xf32>
    %10 = vector.extract_strided_slice %7 {offsets = [0, 0], sizes = [8, 8], strides = [1, 1]} : vector<8x32xf32> to vector<8x8xf32>
    %cst_11 = arith.constant dense<0.000000e+00> : vector<8x8xf32>
    %11 = tpu.matmul %8, %9, %cst_11 {dimension_numbers = #tpu.dot_dimension_numbers<[1], [1], [0], [0], [0, 0, 1, 0], [], []>} : vector<8x8xf32>, vector<8x8xf32>, vector<8x8xf32> -> vector<8x8xf32>
    %cst_12 = arith.constant dense<0xFF800000> : vector<8xf32>
    %12 = vector.multi_reduction <maximumf>, %11, %cst_12 [1] : vector<8x8xf32> to vector<8xf32>
    %13 = vector.shape_cast %12 : vector<8xf32> to vector<8x1xf32>
    %14 = vector.broadcast %13 : vector<8x1xf32> to vector<8x8xf32>
    %15 = arith.subf %11, %14 : vector<8x8xf32>
    %16 = math.exp %15 : vector<8x8xf32>
    %cst_13 = arith.constant dense<0.000000e+00> : vector<8xf32>
    %17 = vector.multi_reduction <add>, %16, %cst_13 [1] : vector<8x8xf32> to vector<8xf32>
    %18 = vector.shape_cast %17 : vector<8xf32> to vector<8x1xf32>
    %cst_14 = arith.constant dense<0.000000e+00> : vector<8x8xf32>
    %19 = tpu.matmul %16, %10, %cst_14 {dimension_numbers = #tpu.dot_dimension_numbers<[1], [0], [0], [1], [0, 0, 1, 1], [], []>} : vector<8x8xf32>, vector<8x8xf32>, vector<8x8xf32> -> vector<8x8xf32>
    %20 = tpu.reciprocal %18 {approx = true} : vector<8x1xf32> -> vector<8x1xf32>
    %21 = vector.broadcast %20 : vector<8x1xf32> to vector<8x8xf32>
    %22 = arith.mulf %19, %21 : vector<8x8xf32>
    %23 = vector.extract_strided_slice %3 {offsets = [0, 8], sizes = [8, 8], strides = [1, 1]} : vector<8x32xf32> to vector<8x8xf32>
    %24 = vector.extract_strided_slice %5 {offsets = [0, 8], sizes = [8, 8], strides = [1, 1]} : vector<8x32xf32> to vector<8x8xf32>
    %25 = vector.extract_strided_slice %7 {offsets = [0, 8], sizes = [8, 8], strides = [1, 1]} : vector<8x32xf32> to vector<8x8xf32>
    %cst_15 = arith.constant dense<0.000000e+00> : vector<8x8xf32>
    %26 = tpu.matmul %23, %24, %cst_15 {dimension_numbers = #tpu.dot_dimension_numbers<[1], [1], [0], [0], [0, 0, 1, 0], [], []>} : vector<8x8xf32>, vector<8x8xf32>, vector<8x8xf32> -> vector<8x8xf32>
    %cst_16 = arith.constant dense<0xFF800000> : vector<8xf32>
    %27 = vector.multi_reduction <maximumf>, %26, %cst_16 [1] : vector<8x8xf32> to vector<8xf32>
    %28 = vector.shape_cast %27 : vector<8xf32> to vector<8x1xf32>
    %29 = vector.broadcast %28 : vector<8x1xf32> to vector<8x8xf32>
    %30 = arith.subf %26, %29 : vector<8x8xf32>
    %31 = math.exp %30 : vector<8x8xf32>
    %cst_17 = arith.constant dense<0.000000e+00> : vector<8xf32>
    %32 = vector.multi_reduction <add>, %31, %cst_17 [1] : vector<8x8xf32> to vector<8xf32>
    %33 = vector.shape_cast %32 : vector<8xf32> to vector<8x1xf32>
    %cst_18 = arith.constant dense<0.000000e+00> : vector<8x8xf32>
    %34 = tpu.matmul %31, %25, %cst_18 {dimension_numbers = #tpu.dot_dimension_numbers<[1], [0], [0], [1], [0, 0, 1, 1], [], []>} : vector<8x8xf32>, vector<8x8xf32>, vector<8x8xf32> -> vector<8x8xf32>
    %35 = tpu.reciprocal %33 {approx = true} : vector<8x1xf32> -> vector<8x1xf32>
    %36 = vector.broadcast %35 : vector<8x1xf32> to vector<8x8xf32>
    %37 = arith.mulf %34, %36 : vector<8x8xf32>
    %38 = vector.extract_strided_slice %3 {offsets = [0, 16], sizes = [8, 8], strides = [1, 1]} : vector<8x32xf32> to vector<8x8xf32>
    %39 = vector.extract_strided_slice %5 {offsets = [0, 16], sizes = [8, 8], strides = [1, 1]} : vector<8x32xf32> to vector<8x8xf32>
    %40 = vector.extract_strided_slice %7 {offsets = [0, 16], sizes = [8, 8], strides = [1, 1]} : vector<8x32xf32> to vector<8x8xf32>
    %cst_19 = arith.constant dense<0.000000e+00> : vector<8x8xf32>
    %41 = tpu.matmul %38, %39, %cst_19 {dimension_numbers = #tpu.dot_dimension_numbers<[1], [1], [0], [0], [0, 0, 1, 0], [], []>} : vector<8x8xf32>, vector<8x8xf32>, vector<8x8xf32> -> vector<8x8xf32>
    %cst_20 = arith.constant dense<0xFF800000> : vector<8xf32>
    %42 = vector.multi_reduction <maximumf>, %41, %cst_20 [1] : vector<8x8xf32> to vector<8xf32>
    %43 = vector.shape_cast %42 : vector<8xf32> to vector<8x1xf32>
    %44 = vector.broadcast %43 : vector<8x1xf32> to vector<8x8xf32>
    %45 = arith.subf %41, %44 : vector<8x8xf32>
    %46 = math.exp %45 : vector<8x8xf32>
    %cst_21 = arith.constant dense<0.000000e+00> : vector<8xf32>
    %47 = vector.multi_reduction <add>, %46, %cst_21 [1] : vector<8x8xf32> to vector<8xf32>
    %48 = vector.shape_cast %47 : vector<8xf32> to vector<8x1xf32>
    %cst_22 = arith.constant dense<0.000000e+00> : vector<8x8xf32>
    %49 = tpu.matmul %46, %40, %cst_22 {dimension_numbers = #tpu.dot_dimension_numbers<[1], [0], [0], [1], [0, 0, 1, 1], [], []>} : vector<8x8xf32>, vector<8x8xf32>, vector<8x8xf32> -> vector<8x8xf32>
    %50 = tpu.reciprocal %48 {approx = true} : vector<8x1xf32> -> vector<8x1xf32>
    %51 = vector.broadcast %50 : vector<8x1xf32> to vector<8x8xf32>
    %52 = arith.mulf %49, %51 : vector<8x8xf32>
    %53 = vector.extract_strided_slice %3 {offsets = [0, 24], sizes = [8, 8], strides = [1, 1]} : vector<8x32xf32> to vector<8x8xf32>
    %54 = vector.extract_strided_slice %5 {offsets = [0, 24], sizes = [8, 8], strides = [1, 1]} : vector<8x32xf32> to vector<8x8xf32>
    %55 = vector.extract_strided_slice %7 {offsets = [0, 24], sizes = [8, 8], strides = [1, 1]} : vector<8x32xf32> to vector<8x8xf32>
    %cst_23 = arith.constant dense<0.000000e+00> : vector<8x8xf32>
    %56 = tpu.matmul %53, %54, %cst_23 {dimension_numbers = #tpu.dot_dimension_numbers<[1], [1], [0], [0], [0, 0, 1, 0], [], []>} : vector<8x8xf32>, vector<8x8xf32>, vector<8x8xf32> -> vector<8x8xf32>
    %cst_24 = arith.constant dense<0xFF800000> : vector<8xf32>
    %57 = vector.multi_reduction <maximumf>, %56, %cst_24 [1] : vector<8x8xf32> to vector<8xf32>
    %58 = vector.shape_cast %57 : vector<8xf32> to vector<8x1xf32>
    %59 = vector.broadcast %58 : vector<8x1xf32> to vector<8x8xf32>
    %60 = arith.subf %56, %59 : vector<8x8xf32>
    %61 = math.exp %60 : vector<8x8xf32>
    %cst_25 = arith.constant dense<0.000000e+00> : vector<8xf32>
    %62 = vector.multi_reduction <add>, %61, %cst_25 [1] : vector<8x8xf32> to vector<8xf32>
    %63 = vector.shape_cast %62 : vector<8xf32> to vector<8x1xf32>
    %cst_26 = arith.constant dense<0.000000e+00> : vector<8x8xf32>
    %64 = tpu.matmul %61, %55, %cst_26 {dimension_numbers = #tpu.dot_dimension_numbers<[1], [0], [0], [1], [0, 0, 1, 1], [], []>} : vector<8x8xf32>, vector<8x8xf32>, vector<8x8xf32> -> vector<8x8xf32>
    %65 = tpu.reciprocal %63 {approx = true} : vector<8x1xf32> -> vector<8x1xf32>
    %66 = vector.broadcast %65 : vector<8x1xf32> to vector<8x8xf32>
    %67 = arith.mulf %64, %66 : vector<8x8xf32>
    %68 = tpu.concatenate %22, %37, %52, %67 in 1 : vector<8x8xf32>, vector<8x8xf32>, vector<8x8xf32>, vector<8x8xf32> -> vector<8x32xf32>
    %69 = vector.shape_cast %68 : vector<8x32xf32> to vector<1x8x32xf32>
    %c0_27 = arith.constant 0 : index
    %c0_28 = arith.constant 0 : index
    %c0_29 = arith.constant 0 : index
    %70 = vector.load %arg5[%c0_27, %c0_28, %c0_29] : memref<1x8x32xf32, #tpu.memory_space<vmem>>, vector<1x8x32xf32>
    tpu.vector_store %arg5[%c0_27, %c0_28, %c0_29], %69 {strides = array<i32>} : memref<1x8x32xf32, #tpu.memory_space<vmem>>, vector<1x8x32xf32>,
    return
  }
  func.func @transform_0(%arg0: i32, %arg1: i32) -> (i32, i32, i32, i32) {
    %c0_i32 = arith.constant 0 : i32
    %c0_i32_0 = arith.constant 0 : i32
    %c0_i32_1 = arith.constant 0 : i32
    return %c0_i32, %arg0, %arg1, %c0_i32_0 : i32, i32, i32, i32
  }
  func.func @transform_1(%arg0: i32, %arg1: i32) -> (i32, i32, i32, i32) {
    %c1_i32 = arith.constant 1 : i32
    %c0_i32 = arith.constant 0 : i32
    %c0_i32_0 = arith.constant 0 : i32
    %c0_i32_1 = arith.constant 0 : i32
    return %c1_i32, %arg0, %c0_i32, %c0_i32_0 : i32, i32, i32, i32
  }
  func.func @transform_2(%arg0: i32, %arg1: i32) -> (i32, i32, i32, i32) {
    %c2_i32 = arith.constant 2 : i32
    %c0_i32 = arith.constant 0 : i32
    %c0_i32_0 = arith.constant 0 : i32
    %c0_i32_1 = arith.constant 0 : i32
    return %c2_i32, %arg0, %c0_i32, %c0_i32_0 : i32, i32, i32, i32
  }
  func.func @transform_3(%arg0: i32, %arg1: i32) -> (i32, i32, i32) {
    %c0_i32 = arith.constant 0 : i32
    %c0_i32_0 = arith.constant 0 : i32
    return %arg0, %arg1, %c0_i32 : i32, i32, i32
  }
}

module attributes {stable_mosaic.version = 11 : i64} {
  func.func @_linear_residual_kernel(%arg0: i32, %arg1: i32, %arg2: i32, %arg3: memref<16x128xf32, #tpu.memory_space<vmem>>, %arg4: memref<128x32xf32, #tpu.memory_space<vmem>>, %arg5: memref<1x32xf32, #tpu.memory_space<vmem>>, %arg6: memref<16x32xf32, #tpu.memory_space<vmem>>, %arg7: memref<16x32xf32, #tpu.memory_space<vmem>>, %arg8: memref<16x32xf32, #tpu.memory_space<vmem>>) attributes {dimension_semantics = [#tpu.dimension_semantics<parallel>, #tpu.dimension_semantics<parallel>, #tpu.dimension_semantics<arbitrary>], iteration_bounds = array<i64: 1, 1, 1>, scalar_prefetch = 0 : i64, scratch_operands = 1 : i64, tpu.core_type = #tpu.core_type<tc>, window_params = [{transform_indices = @transform_0, window_bounds = array<i64: 16, 128>}, {transform_indices = @transform_1, window_bounds = array<i64: 128, 32>}, {transform_indices = @transform_2, window_bounds = array<i64: 1, 32>}, {transform_indices = @transform_3, window_bounds = array<i64: 16, 32>}, {transform_indices = @transform_4, window_bounds = array<i64: 16, 32>}]} {
    %c0_i32 = arith.constant 0 : i32
    %0 = arith.cmpi eq, %arg2, %c0_i32 : i32
    %1 = arith.extui %0 : i1 to i32
    %c0_i32_0 = arith.constant 0 : i32
    %2 = arith.cmpi ne, %1, %c0_i32_0 : i32
    scf.if %2 {
      %cst_10 = arith.constant 0.000000e+00 : f32
      %12 = vector.broadcast %cst_10 : f32 to vector<16x32xf32>
      %c0_11 = arith.constant 0 : index
      %c0_12 = arith.constant 0 : index
      %13 = vector.load %arg8[%c0_11, %c0_12] : memref<16x32xf32, #tpu.memory_space<vmem>>, vector<16x32xf32>
      tpu.vector_store %arg8[%c0_11, %c0_12], %12 {strides = array<i32>} : memref<16x32xf32, #tpu.memory_space<vmem>>, vector<16x32xf32>,
    } else {
    }
    %c0 = arith.constant 0 : index
    %c0_1 = arith.constant 0 : index
    %3 = vector.load %arg8[%c0, %c0_1] : memref<16x32xf32, #tpu.memory_space<vmem>>, vector<16x32xf32>
    %c0_2 = arith.constant 0 : index
    %c0_3 = arith.constant 0 : index
    %4 = vector.load %arg3[%c0_2, %c0_3] : memref<16x128xf32, #tpu.memory_space<vmem>>, vector<16x128xf32>
    %c0_4 = arith.constant 0 : index
    %c0_5 = arith.constant 0 : index
    %5 = vector.load %arg4[%c0_4, %c0_5] : memref<128x32xf32, #tpu.memory_space<vmem>>, vector<128x32xf32>
    %cst = arith.constant dense<0.000000e+00> : vector<16x32xf32>
    %6 = tpu.matmul %4, %5, %cst {dimension_numbers = #tpu.dot_dimension_numbers<[1], [0], [0], [1], [0, 0, 1, 1], [], []>} : vector<16x128xf32>, vector<128x32xf32>, vector<16x32xf32> -> vector<16x32xf32>
    %7 = arith.addf %3, %6 : vector<16x32xf32>
    %c0_6 = arith.constant 0 : index
    %c0_7 = arith.constant 0 : index
    %8 = vector.load %arg8[%c0_6, %c0_7] : memref<16x32xf32, #tpu.memory_space<vmem>>, vector<16x32xf32>
    tpu.vector_store %arg8[%c0_6, %c0_7], %7 {strides = array<i32>} : memref<16x32xf32, #tpu.memory_space<vmem>>, vector<16x32xf32>,
    %c0_i32_8 = arith.constant 0 : i32
    %9 = arith.cmpi eq, %arg2, %c0_i32_8 : i32
    %10 = arith.extui %9 : i1 to i32
    %c0_i32_9 = arith.constant 0 : i32
    %11 = arith.cmpi ne, %10, %c0_i32_9 : i32
    scf.if %11 {
      %c0_10 = arith.constant 0 : index
      %c0_11 = arith.constant 0 : index
      %12 = vector.load %arg8[%c0_10, %c0_11] : memref<16x32xf32, #tpu.memory_space<vmem>>, vector<16x32xf32>
      %c0_12 = arith.constant 0 : index
      %c0_13 = arith.constant 0 : index
      %13 = vector.load %arg5[%c0_12, %c0_13] : memref<1x32xf32, #tpu.memory_space<vmem>>, vector<1x32xf32>
      %14 = vector.broadcast %13 : vector<1x32xf32> to vector<16x32xf32>
      %15 = arith.addf %12, %14 : vector<16x32xf32>
      %c0_14 = arith.constant 0 : index
      %c0_15 = arith.constant 0 : index
      %16 = vector.load %arg6[%c0_14, %c0_15] : memref<16x32xf32, #tpu.memory_space<vmem>>, vector<16x32xf32>
      %17 = arith.addf %15, %16 : vector<16x32xf32>
      %c0_16 = arith.constant 0 : index
      %c0_17 = arith.constant 0 : index
      %18 = vector.load %arg7[%c0_16, %c0_17] : memref<16x32xf32, #tpu.memory_space<vmem>>, vector<16x32xf32>
      tpu.vector_store %arg7[%c0_16, %c0_17], %17 {strides = array<i32>} : memref<16x32xf32, #tpu.memory_space<vmem>>, vector<16x32xf32>,
    } else {
    }
    return
  }
  func.func @transform_0(%arg0: i32, %arg1: i32, %arg2: i32) -> (i32, i32) {
    %c0_i32 = arith.constant 0 : i32
    return %arg0, %arg2 : i32, i32
  }
  func.func @transform_1(%arg0: i32, %arg1: i32, %arg2: i32) -> (i32, i32) {
    %c0_i32 = arith.constant 0 : i32
    return %arg2, %arg1 : i32, i32
  }
  func.func @transform_2(%arg0: i32, %arg1: i32, %arg2: i32) -> (i32, i32) {
    %c0_i32 = arith.constant 0 : i32
    %c0_i32_0 = arith.constant 0 : i32
    return %c0_i32, %arg1 : i32, i32
  }
  func.func @transform_3(%arg0: i32, %arg1: i32, %arg2: i32) -> (i32, i32) {
    %c0_i32 = arith.constant 0 : i32
    return %arg0, %arg1 : i32, i32
  }
  func.func @transform_4(%arg0: i32, %arg1: i32, %arg2: i32) -> (i32, i32) {
    %c0_i32 = arith.constant 0 : i32
    return %arg0, %arg1 : i32, i32
  }
}

</mosaic_0001>

<bundles_post_ra>
// kernel: transformer_block_forward.8
= control target key start
LH: loop header
LB: loop body
LE: loop exit
PB: predicated region body
PF: predicated region fallthrough
CT: control target
= control target key end

     0   :  { %vm22_vm0 = vcmask 261120   ;;  %s283_s0 = inlined_call_operand.vmem [shape: f32[16,32], index: 0, kind: input, shape index: {}]   ;;  %s284_s3 = inlined_call_operand.vmem [shape: f32[32,128], index: 3, kind: input, shape index: {}]   ;;  %s285_s1 = inlined_call_operand.vmem [shape: f32[1,32], index: 1, kind: input, shape index: {}]   ;;  %s286_s2 = inlined_call_operand.vmem [shape: f32[1,32], index: 2, kind: input, shape index: {}]   ;;  %s287_s4 = inlined_call_operand.vmem [shape: f32[1,128], index: 4, kind: input, shape index: {}]   ;;  %s288_s5 = inlined_call_operand.vmem [shape: f32[16,128], index: 5, kind: output, shape index: {}]  }
   0x1   :  { %v20_v0 = vld [vmem:[%s283_s0] sm:$0xff]  ;;  %v21_v1 = vld [vmem:[%s283_s0 + $0x8] sm:$0xff]  ;;  %v70_v16 = vld [vmem:[%s284_s3 + $0x10] sm:$0xff] }
   0x2   :  { %v23_v2 = vsel %vm22_vm0, %v20_v0, 0.0  ;;  %v26_v3 = vsel %vm22_vm0, %v21_v1, 0.0  ;;  %v68_v14 = vld [vmem:[%s284_s3] sm:$0xff]  ;;  %v69_v15 = vld [vmem:[%s284_s3 + $0x8] sm:$0xff]  ;;  %v71_v18 = vld [vmem:[%s284_s3 + $0x18] sm:$0xff] }
   0x3   :  { %24 = vadd.xlane.f32.xlu0 %v23_v2  ;;  %v198_v17 = vpack.c.bf16 %v69_v15, %v68_v14  ;;  %v202_v19 = vpack.c.bf16 %v71_v18, %v70_v16  ;;  %v176_v27 = vld [vmem:[%s285_s1] ss:$0 sm:$0xff] }
   0x4   :  { %v177_v29 = vld [vmem:[%s286_s2] ss:$0 sm:$0xff] }
   0x5   :  { %199 = vmatprep.subr.bf16.mxu0 %v198_v17  ;;  %v178_v36 = vld [vmem:[%s287_s4] ss:$0 sm:$0xff] }
   0x6   :  { %201 = vmatpush3.bf16.msra.mxu0 %v198_v17 }
   0x7   :  { %27 = vadd.xlane.f32.xlu0 %v26_v3  ;;  %203 = vmatprep.subr.bf16.mxu0 %v202_v19 }
   0xa   :  { %205 = vmatpush3.bf16.msra.mxu0 %v202_v19 }
  0x90   :  { %v25_v4 = vpop.xlane.xlu0 %24 }
  0x91   :  { %v30_v5 = vmul.f32 0.03125, %v25_v4 }
  0x93   :  { %v32_v6 = vsub.f32 %v20_v0, %v30_v5 }
  0x94   :  { %v28_v7 = vpop.xlane.xlu0 %27 }
  0x95   :  { %v31_v8 = vmul.f32 0.03125, %v28_v7  ;;  %v34_v9 = vmul.f32 %v32_v6, %v32_v6 }
  0x97   :  { %v33_v10 = vsub.f32 %v21_v1, %v31_v8  ;;  %v36_v11 = vsel %vm22_vm0, %v34_v9, 0.0 }
  0x98   :  { %37 = vadd.xlane.f32.xlu1 %v36_v11 }
  0x99   :  { %v35_v12 = vmul.f32 %v33_v10, %v33_v10 }
  0x9b   :  { %v39_v13 = vsel %vm22_vm0, %v35_v12, 0.0 }
  0x9c   :  { %40 = vadd.xlane.f32.xlu1 %v39_v13 }
 0x125   :  { %v38_v20 = vpop.xlane.xlu1 %37 }
 0x126   :  { %v42_v21 = vmul.f32 0.03125, %v38_v20 }
 0x128   :  { %v44_v22 = vadd.f32 1e-05, %v42_v21 }
 0x129   :  { %v41_v23 = vpop.xlane.xlu1 %40 }
 0x12a   :  { %206 = vrsqrt.f32 %v44_v22  ;;  %v43_v24 = vmul.f32 0.03125, %v41_v23 }
 0x12c   :  { %v45_v25 = vadd.f32 1e-05, %v43_v24 }
 0x12e   :  { %208 = vrsqrt.f32 %v45_v25 }
 0x134   :  { %v207_v26 = vpop.eup %206 }
 0x135   :  { %v48_v28 = vmul.f32 %v207_v26, %v32_v6 }
 0x137   :  { %v57_v30 = vmul.f32 %v176_v27, %v48_v28 }
 0x138   :  { %v209_v31 = vpop.eup %208 }
 0x139   :  { %v49_v32 = vmul.f32 %v209_v31, %v33_v10  ;;  %v66_v33 = vadd.f32 %v177_v29, %v57_v30 }
 0x13b   :  { %v58_v34 = vmul.f32 %v176_v27, %v49_v32  ;;  %195 = vmatprep.mubr.msk.f32.mxu0 %vm22_vm0, %v66_v33 }
 0x13d   :  { %v67_v35 = vadd.f32 %v177_v29, %v58_v34 }
 0x13f   :  { %196 = vmatmul.mubr.msk.f32.vlgmr.msra.gmra.mrb[0].mxu0 %vm22_vm0, %v67_v35 }
 0x212   :  { %v197_v37 = vpop.f32.mrb[0].mxu0 }
 0x213   :  { %v157_v38 = vadd.f32 %v197_v37, %v178_v36  ;;  %v151_v39 = vpop.f32.mrb[1].mxu0 }
 0x214   :  { %v152_v40 = vadd.f32 %v178_v36, %v151_v39 }
 0x215   :  { %v163_v41 = vmul.f32 0.70710677, %v157_v38  ;;  %v161_v45 = vmul.f32 0.5, %v157_v38 }
 0x216   :  { %v162_v42 = vmul.f32 0.70710677, %v152_v40  ;;  %v160_v47 = vmul.f32 0.5, %v152_v40 }
 0x217   :  { %210 = verf.f32 %v163_v41 }
 0x218   :  { %212 = verf.f32 %v162_v42 }
 0x221   :  { %v211_v43 = vpop.eup %210 }
 0x222   :  { %v213_v44 = vpop.eup %212  ;;  %v167_v46 = vadd.f32 1.0, %v211_v43 }
 0x223   :  { %v166_v48 = vadd.f32 1.0, %v213_v44 }
 0x224   :  { %v169_v49 = vmul.f32 %v167_v46, %v161_v45 }
 0x225   :  { %v168_v50 = vmul.f32 %v166_v48, %v160_v47 }
 0x226   :  { %171 = vst [vmem:[%s288_s5 + $0x8] sm:$0xff] %v169_v49 }
 0x227   :  { %170 = vst [vmem:[%s288_s5] sm:$0xff] %v168_v50 }

// kernel: transformer_block_forward.5
= control target key start
LH: loop header
LB: loop body
LE: loop exit
PB: predicated region body
PF: predicated region fallthrough
CT: control target
= control target key end

     0   :  { %10 = vsyncpa [#allocation3], 0  ;;  %s978_s0 = inlined_call_operand.vmem [shape: f32[16,32], index: 0, kind: input, shape index: {}]   ;;  %s979_s1 = inlined_call_operand.vmem [shape: f32[1,32], index: 1, kind: input, shape index: {}]   ;;  %s980_s2 = inlined_call_operand.vmem [shape: f32[1,32], index: 2, kind: input, shape index: {}]   ;;  %s981_s3 = inlined_call_operand.hbm [shape: f32[3,32,32], index: 3, kind: input, shape index: {}]   ;;  %s982_s4 = inlined_call_operand.vmem [shape: f32[3,1,32], index: 4, kind: input, shape index: {}]   ;;  %s983_s5 = inlined_call_operand.vmem [shape: f32[3,16,32], index: 5, kind: output, shape index: {}]  }
   0x1   :  { %12 = vsyncpa [#allocation3 + $0x1], 0  ;;  %s831_s18 = smov 0   ;;  %s833_s19 = smov 0  }
   0x2   :  { %s835_s20 = smov 0   ;;  %s837_s21 = smov 0  }
   0x3   :  { %s839_s22 = smov 0   ;;  %s841_s23 = smov 0  }
   0x4 LB: > { %s609_s24 = sadd.s32 4294967295, %s796_s23   ;;  %s33_s25 = sadd.s32 1, %s792_s22  ;;  %s796_s23 = sphi %s841_s23, %s18_s23   ;;  %s792_s22 = sphi %s839_s22, %s991_s22   ;;  %s788_s21 = sphi %s837_s21, %s990_s21   ;;  %s784_s20 = sphi %s835_s20, %s989_s20   ;;  %s780_s19 = sphi %s833_s19, %s988_s19   ;;  %s776_s18 = sphi %s831_s18, %s987_s18  }
   0x5   : > { %p35_p0 = scmp.ge.s32.totalorder %s33_s25, 3  ;;  %s114_s26 = sadd.s32 1, %s784_s20 }
   0x6   : > { %p121_p1 = scmp.ne.s32.totalorder %s784_s20, %s780_s19  ;;  %p122_p2 = scmp.eq.s32.totalorder %s796_s23, 0 }
   0x7   : > { %s993_s25 = smov (%p35_p0, %s33_s25), 0  ;;  %p127_p4 = scmp.ne.s32.totalorder %s780_s19, %s776_s18 }
   0x8   : > { %p867_p3 = por %p122_p2, %p121_p1  ;;  %s109_s28 = ssub.s32 %s792_s22, %s993_s25 }
   0x9   : > { %p128_p5 = scmp.eq.s32.totalorder %s609_s24, 0  ;;  %p112_p6 = scmp.eq.s32.totalorder %s109_s28, 0 }
   0xa   : > { %p661_p8 = scmp.lt.s32.totalorder %s796_s23, 3  ;;  %s224_s6 = sand.u32 1, %s784_s20  }
   0xb   : > { %p874_p7 = por %p128_p5, %p127_p4  ;;  %s628_s7 = sshll.u32 %s792_s22, 9 }
   0xc   : > { %s880_s30 = scalar_select %p112_p6, %s784_s20, %s114_s26  }
   0xd   : > { %s614_s8 = sshll.u32 %s224_s6, 5  ;;  %s887_s11 = scalar_lea.hbm %s981_s3, %s628_s7 }
   0xe   : > { %s228_s12 = scalar_lea.vmem [#allocation2], %s614_s8  ;;  %p891_p9 = pnand %p661_p8, %p867_p3 }
   0xf   : > { %s236_s13 = sshll.u32 %s228_s12, 4  ;;  %s897_s15 = scalar_lea.sflag [#allocation3], %s224_s6  ;;  %s895_s13 = int_to_ptr.vmem [resolvable:$true] %s236_s13 }
  0x10   : > { %s716_s16 = scalar_lea.hbm %s887_s11, 512  ;;  %p718_p11 = pneg %p891_p9 }
  0x11   : > { %p717_p10 = scmp.ne.s32.totalorder %s887_s11, %s716_s16  ;;  %s721_s24 = scalar_lea.hbm %s981_s3, 1536 }
  0x12   : > { %p722_p0 = scmp.lt.u32.totalorder %s887_s11, %s981_s3  ;;  %p723_p1 = scmp.lt.u32.totalorder %s721_s24, %s716_s16 }
  0x13   : > { %p719_p12 = pnand %p718_p11, %p717_p10  ;;  %p725_p3 = scmp.lt.u32.totalorder %s716_s16, %s887_s11 }
  0x14   : > { %p724_p2 = por %p723_p1, %p722_p0 }
  0x15   : > { %p720_p13 = pneg %p719_p12 }
  0x16   : > { %p726_p4 = por %p725_p3, %p724_p2 }
  0x18   : > { %p727_p5 = pnand %p726_p4, %p720_p13 }
  0x1a   : > { %730 = shalt.err (!%p727_p5)
}
  0x1b   : > { %s731_s28 = scalar_lea.vmem %s895_s13, 512  ;;  %s798_s6 = smov [#allocation2]  }
  0x1c   : > { %p732_p6 = scmp.ne.s32.totalorder %s895_s13, %s731_s28  ;;  %s736_s7 = sshll.u32 %s798_s6, 4  ;;  %s737_s7 = int_to_ptr.vmem [resolvable:$false] %s736_s7 }
  0x1d   : > { %s738_s8 = scalar_lea.vmem %s737_s7, 1024  ;;  %p739_p12 = scmp.lt.s32.totalorder %s895_s13, %s737_s7 }
  0x1e   : > { %p734_p8 = pnand %p732_p6, %p718_p11  ;;  %p740_p0 = scmp.lt.s32.totalorder %s738_s8, %s731_s28 }
  0x20   : > { %p735_p10 = pneg %p734_p8  ;;  %p741_p1 = por %p740_p0, %p739_p12 }
  0x22   : > { %p742_p2 = pnand %p741_p1, %p735_p10 }
  0x24   : > { %745 = shalt.err (!%p742_p2)
}
  0x25   : > { %s799_s9 = smov 128   ;;  %s800_s10 = smov 8  }
  0x26   : > { %660 = dma.hbm_to_vmem [thread:$0]  (!%p891_p9), %s887_s11, 512, %s895_s13, %s897_s15, %s799_s9, %s799_s9, %s800_s10  }
  0x27   : > { %p617_p11 = scmp.ge.s32.totalorder %s796_s23, 1  ;;  %p253_p13 = scmp.lt.s32.totalorder %s796_s23, 4 }
  0x29   : > { %p254_p3 = pnand %p617_p11, %p253_p13 }
  0x2a   : > { %s259_s12 = sand.u32 (!%p254_p3), 1, %s780_s19  }
  0x2b   : > { %257 = sbr.rel (%p254_p3) target bundleno = 585 (0x249), region = 40  ;;  %s618_s16 = sshll.u32 (!%p254_p3), %s259_s12, 5 }
  0x2c   : > { %s260_s17 = scalar_lea.sflag (!%p254_p3), [#allocation3], %s259_s12  ;;  %s263_s18 = scalar_lea.vmem (!%p254_p3), [#allocation2], %s618_s16 }
  0x32   : > { %771 = dma.done.wait (%p874_p7), %s260_s17, 512  }
  0x33   : > { %773 = vsyncadd (%p874_p7), %s260_s17, 4294966784  ;;  %vm335_vm0 = vcmask 261120   ;;  %v333_v0 = vld [vmem:[%s978_s0] sm:$0xff]  ;;  %v334_v1 = vld [vmem:[%s978_s0 + $0x8] sm:$0xff]  ;;  %p314_p7 = scmp.lt.s32.totalorder %s788_s21, 2 }
  0x34   : > { %v336_v2 = vsel %vm335_vm0, %v333_v0, 0.0  ;;  %v339_v3 = vsel %vm335_vm0, %v334_v1, 0.0  ;;  %v381_v14 = vld [vmem:[%s263_s18] sm:$0xff]  ;;  %v382_v15 = vld [vmem:[%s263_s18 + $0x8] sm:$0xff]  ;;  %v383_v16 = vld [vmem:[%s263_s18 + $0x10] sm:$0xff] }
  0x35   : > { %337 = vadd.xlane.f32.xlu0 %v336_v2  ;;  %v647_v17 = vpack.c.bf16 %v382_v15, %v381_v14  ;;  %v384_v18 = vld [vmem:[%s263_s18 + $0x18] sm:$0xff]  ;;  %v621_v27 = vld [vmem:[%s979_s1] ss:$0 sm:$0xff]  ;;  %s995_s21 = smov (!%p314_p7, %s788_s21), 2 }
  0x36   : > { %v651_v19 = vpack.c.bf16 %v384_v18, %v383_v16  ;;  %v622_v29 = vld [vmem:[%s980_s2] ss:$0 sm:$0xff]  ;;  %s319_s7 = scalar_lea.vmem %s982_s4, %s995_s21  ;;  %s629_s8 = sshll.u32 %s995_s21, 4 }
  0x37   : > { %648 = vmatprep.subr.bf16.mxu0 %v647_v17  ;;  %v623_v36 = vld [vmem:[%s319_s7] ss:$0 sm:$0xff]  ;;  %s331_s12 = scalar_lea.vmem %s983_s5, %s629_s8 }
  0x38   : > { %650 = vmatpush3.bf16.msra.mxu0 %v647_v17 }
  0x39   : > { %340 = vadd.xlane.f32.xlu0 %v339_v3  ;;  %652 = vmatprep.subr.bf16.mxu0 %v651_v19 }
  0x3c   : > { %654 = vmatpush3.bf16.msra.mxu0 %v651_v19 }
  0xc2   : > { %v338_v4 = vpop.xlane.xlu0 %337 }
  0xc3   : > { %v343_v5 = vmul.f32 0.03125, %v338_v4 }
  0xc5   : > { %v345_v6 = vsub.f32 %v333_v0, %v343_v5 }
  0xc6   : > { %v341_v7 = vpop.xlane.xlu0 %340 }
  0xc7   : > { %v344_v8 = vmul.f32 0.03125, %v341_v7  ;;  %v347_v9 = vmul.f32 %v345_v6, %v345_v6 }
  0xc9   : > { %v346_v10 = vsub.f32 %v334_v1, %v344_v8  ;;  %v349_v11 = vsel %vm335_vm0, %v347_v9, 0.0 }
  0xca   : > { %350 = vadd.xlane.f32.xlu1 %v349_v11 }
  0xcb   : > { %v348_v12 = vmul.f32 %v346_v10, %v346_v10 }
  0xcd   : > { %v352_v13 = vsel %vm335_vm0, %v348_v12, 0.0 }
  0xce   : > { %353 = vadd.xlane.f32.xlu1 %v352_v13 }
 0x157   : > { %v351_v20 = vpop.xlane.xlu1 %350 }
 0x158   : > { %v355_v21 = vmul.f32 0.03125, %v351_v20 }
 0x15a   : > { %v357_v22 = vadd.f32 1e-05, %v355_v21 }
 0x15b   : > { %v354_v23 = vpop.xlane.xlu1 %353 }
 0x15c   : > { %712 = vrsqrt.f32 %v357_v22  ;;  %v356_v24 = vmul.f32 0.03125, %v354_v23 }
 0x15e   : > { %v358_v25 = vadd.f32 1e-05, %v356_v24 }
 0x160   : > { %714 = vrsqrt.f32 %v358_v25 }
 0x166   : > { %v713_v26 = vpop.eup %712 }
 0x167   : > { %v361_v28 = vmul.f32 %v713_v26, %v345_v6 }
 0x169   : > { %v370_v30 = vmul.f32 %v621_v27, %v361_v28 }
 0x16a   : > { %v715_v31 = vpop.eup %714 }
 0x16b   : > { %v362_v32 = vmul.f32 %v715_v31, %v346_v10  ;;  %v379_v33 = vadd.f32 %v622_v29, %v370_v30 }
 0x16d   : > { %v371_v34 = vmul.f32 %v621_v27, %v362_v32  ;;  %644 = vmatprep.mubr.msk.f32.mxu0 %vm335_vm0, %v379_v33 }
 0x16f   : > { %v380_v35 = vadd.f32 %v622_v29, %v371_v34 }
 0x171   : > { %645 = vmatmul.mubr.msk.f32.vlgmr.msra.gmra.mrb[0].mxu0 %vm335_vm0, %v380_v35 }
 0x244   : > { %v646_v37 = vpop.f32.mrb[0].mxu0 }
 0x245   : > { %v470_v38 = vadd.f32 %v646_v37, %v623_v36  ;;  %v464_v39 = vpop.f32.mrb[1].mxu0 }
 0x246   : > { %v465_v40 = vadd.f32 %v623_v36, %v464_v39 }
 0x247   : > { %474 = vst.msk [vmem:[%s331_s12 + $0x8] sm:$0xff] %vm335_vm0, %v470_v38 }
 0x248   : > { %473 = vst.msk [vmem:[%s331_s12] sm:$0xff] %vm335_vm0, %v465_v40 }
 0x249 PF: > { %s18_s23 = sadd.s32 1, %s796_s23   ;;  %s987_s18 = smov %s780_s19 }
 0x24a   : > { %p15_p9 = scmp.ge.s32.totalorder %s18_s23, 5   ;;  %s988_s19 = smov %s784_s20 }
 0x24b   : > { %s989_s20 = smov %s880_s30  ;;  %s990_s21 = smov %s792_s22 }
 0x24c   : > { %s991_s22 = smov %s993_s25  ;;  %17 = sbr.rel (!%p15_p9) target bundleno = 4 (0x4), region = 86 }
 0x253   :  { %511 = vsyncpa [#allocation3], 1 }
 0x254   :  { %513 = vsyncpa [#allocation3 + $0x1], 1 }

// kernel: transformer_block_forward.7
= control target key start
LH: loop header
LB: loop body
LE: loop exit
PB: predicated region body
PF: predicated region fallthrough
CT: control target
= control target key end

     0   :  { %vm21_vm0 = vcmask 261120   ;;  %v171_v3 = vmov 0.0   ;;  %s238_s1 = inlined_call_operand.vmem [shape: f32[32,32], index: 1, kind: input, shape index: {}]   ;;  %s239_s0 = inlined_call_operand.vmem [shape: f32[16,32], index: 0, kind: input, shape index: {}]   ;;  %s240_s2 = inlined_call_operand.vmem [shape: f32[1,32], index: 2, kind: input, shape index: {}]   ;;  %s241_s3 = inlined_call_operand.vmem [shape: f32[16,32], index: 3, kind: input, shape index: {}]   ;;  %s242_s4 = inlined_call_operand.vmem [shape: f32[16,32], index: 4, kind: output, shape index: {}]  }
   0x1   :  { %v28_v0 = vld [vmem:[%s238_s1] sm:$0xff]  ;;  %v29_v1 = vld [vmem:[%s238_s1 + $0x8] sm:$0xff]  ;;  %v30_v2 = vld [vmem:[%s238_s1 + $0x10] sm:$0xff]  ;;  %23 = vst.msk [vmem:[#allocation2 + $0x8] sm:$0xff] %vm21_vm0, %v171_v3 }
   0x2   :  { %22 = vst.msk [vmem:[#allocation2] sm:$0xff] %vm21_vm0, %v171_v3  ;;  %v162_v4 = vpack.c.bf16 %v29_v1, %v28_v0  ;;  %v31_v5 = vld [vmem:[%s238_s1 + $0x18] sm:$0xff]  ;;  %v26_v6 = vld [vmem:[%s239_s0] sm:$0xff]  ;;  %v27_v8 = vld [vmem:[%s239_s0 + $0x8] sm:$0xff] }
   0x3   :  { %v166_v7 = vpack.c.bf16 %v31_v5, %v30_v2  ;;  %159 = vmatprep.mubr.msk.f32.mxu0 %vm21_vm0, %v26_v6  ;;  %v144_v15 = vld [vmem:[%s240_s2] ss:$0 sm:$0xff]  ;;  %v133_v17 = vld [vmem:[%s241_s3 + $0x8] sm:$0xff] }
   0x4   :  { %163 = vmatprep.subr.bf16.mxu0 %v162_v4  ;;  %v132_v20 = vld [vmem:[%s241_s3] sm:$0xff] }
   0x5   :  { %165 = vmatpush3.bf16.msra.mxu0 %v162_v4 }
   0x6   :  { %167 = vmatprep.subr.bf16.mxu0 %v166_v7 }
   0x8   :  { %v25_v9 = vld [vmem:[#allocation2 + $0x8] sm:$0xff] }
   0x9   :  { %169 = vmatpush3.bf16.msra.mxu0 %v166_v7  ;;  %v24_v10 = vld [vmem:[#allocation2] sm:$0xff] }
   0xc   :  { %160 = vmatmul.mubr.msk.f32.vlgmr.msra.gmra.mrb[0].mxu0 %vm21_vm0, %v27_v8 }
  0xdf   :  { %v161_v11 = vpop.f32.mrb[0].mxu0 }
  0xe0   :  { %v115_v12 = vadd.f32 %v161_v11, %v25_v9  ;;  %v105_v13 = vpop.f32.mrb[1].mxu0 }
  0xe1   :  { %v114_v14 = vadd.f32 %v105_v13, %v24_v10 }
  0xe2   :  { %117 = vst.msk [vmem:[#allocation2 + $0x8] sm:$0xff] %vm21_vm0, %v115_v12 }
  0xe3   :  { %116 = vst.msk [vmem:[#allocation2] sm:$0xff] %vm21_vm0, %v114_v14 }
  0xe9   :  { %v122_v16 = vld [vmem:[#allocation2 + $0x8] sm:$0xff] }
  0xea   :  { %v131_v18 = vadd.f32 %v144_v15, %v122_v16  ;;  %v121_v19 = vld [vmem:[#allocation2] sm:$0xff] }
  0xeb   :  { %v130_v21 = vadd.f32 %v144_v15, %v121_v19 }
  0xec   :  { %v135_v22 = vadd.f32 %v133_v17, %v131_v18 }
  0xed   :  { %v134_v23 = vadd.f32 %v132_v20, %v130_v21 }
  0xee   :  { %137 = vst.msk [vmem:[%s242_s4 + $0x8] sm:$0xff] %vm21_vm0, %v135_v22 }
  0xef   :  { %136 = vst.msk [vmem:[%s242_s4] sm:$0xff] %vm21_vm0, %v134_v23 }

// kernel: transformer_block_forward.6
= control target key start
LH: loop header
LB: loop body
LE: loop exit
PB: predicated region body
PF: predicated region fallthrough
CT: control target
= control target key end

     0   :  { %s1202_s12 = smov 0   ;;  %s1204_s13 = smov 0   ;;  %s1308_s0 = inlined_call_operand.vmem [shape: f32[3,2,8,32], index: 0, kind: input, shape index: {}, may-alias: {0,1,2}]   ;;  %s1309_s1 = inlined_call_operand.vmem [shape: f32[3,2,8,32], index: 1, kind: input, shape index: {}, may-alias: {0,1,2}]   ;;  %s1310_s2 = inlined_call_operand.vmem [shape: f32[3,2,8,32], index: 2, kind: input, shape index: {}, may-alias: {0,1,2}]   ;;  %s1311_s3 = inlined_call_operand.vmem [shape: f32[2,8,32], index: 3, kind: output, shape index: {}]  }
   0x1   :  { %s1206_s14 = smov 0  }
   0x2 LB: > { %s25_s15 = sadd.s32 1, %s1168_s13  ;;  %p1025_p0 = scmp.ge.s32.totalorder %s1172_s14, 1  ;;  %s1172_s14 = sphi %s1206_s14, %s13_s14   ;;  %s1168_s13 = sphi %s1204_s13, %s1313_s13   ;;  %s1164_s12 = sphi %s1202_s12, %s1312_s12  }
   0x3   : > { %p27_p1 = scmp.ge.s32.totalorder %s25_s15, 2  ;;  %p175_p2 = scmp.lt.s32.totalorder %s1172_s14, 3 }
   0x5   : > { %s1315_s15 = smov (%p27_p1, %s25_s15), 0  ;;  %p176_p3 = pnand %p1025_p0, %p175_p2 }
   0x6   : > { %p213_p4 = scmp.lt.s32.totalorder (!%p176_p3), %s1164_s12, 1  ;;  %v1174_v0 = vmov (!%p176_p3), 0.0   ;;  %vm1175_vm0 = vmmov (!%p176_p3), 0   ;;  %vm241_vm1 = vcmask (!%p176_p3), 64512   ;;  %s1176_s23 = smov (!%p176_p3), 120   ;;  %vm911_vm2 = vcmask (!%p176_p3), 130048  }
   0x7   : > { %179 = sbr.rel (%p176_p3) target bundleno = 1149 (0x47d), region = 32  ;;  %1062 = vmatprep.subr.mxu0 (!%p176_p3), %v1174_v0  ;;  %1064 = vmatprep.mubr.msk.f32.mxu0 (!%p176_p3), %vm1175_vm0, %v1174_v0  ;;  %s1177_s24 = smov (!%p176_p3), 112   ;;  %vm913_vm3 = vcmask (!%p176_p3), 195584   ;;  %vm915_vm4 = vcmask (!%p176_p3), 261120  }
   0x8   : > { %1067 = vmatprep.subr.mxu1 (!%p176_p3), %v1174_v0  ;;  %1069 = vmatprep.mubr.msk.f32.mxu1 (!%p176_p3), %vm1175_vm0, %v1174_v0  ;;  %s1178_s25 = smov (!%p176_p3), 104   ;;  %s1179_s29 = smov (!%p176_p3), 8  }
   0x9   : > { %s1180_s30 = smov (!%p176_p3), 16   ;;  %s1181_s4 = smov (!%p176_p3), 24  }
   0xe   : > { %s1317_s12 = smov (!%p213_p4, %s1164_s12), 1 }
   0xf   : > { %s1226_s16 = sshll.u32 %s1317_s12, 3 }
  0x10   : > { %s967_s19 = scalar_lea.vmem %s1309_s1, %s1226_s16  ;;  %s219_s22 = scalar_lea.vmem %s1308_s0, %s1226_s16 }
  0x11   : > { %v1030_v1 = vld [vmem:[%s967_s19 + $0x10] sm:$0xff]  ;;  %v237_v2 = vld [vmem:[%s219_s22] sm:$0xff]  ;;  %s970_s28 = scalar_lea.vmem %s1310_s2, %s1226_s16  ;;  %s236_s7 = scalar_lea.vmem %s1311_s3, %s1226_s16 }
  0x12   : > { %1063 = vmatpush3.xpose.msk.msra.mxu0 %vm241_vm1, %v1030_v1  ;;  %v238_v3 = vmul.f32 0.35355338, %v237_v2  ;;  %v1031_v7 = vld [vmem:[%s970_s28 + $0x20] sm:$0xff] }
  0x13   : > { %1077 = vmatprep.subr.mxu0 %v1174_v0  ;;  %1068 = vmatpush3.msra.mxu1 %v1031_v7 }
  0x14   : > { %402 = vrot.lane.b32.xlu1 %v238_v3, %s1176_s23  ;;  %1072 = vmatprep.subr.mxu1 %v1174_v0 }
  0x15   : > { %1065 = vmatmul.mubr.msk.f32.vlgmr.msra.gmra.mrb[0].mxu0 %vm241_vm1, %v238_v3 }
  0x16   : > { %1079 = vmatprep.mubr.msk.f32.mxu0 %vm1175_vm0, %v1174_v0 }
  0x18   : > { %570 = vrot.lane.b32.xlu1 %v1030_v1, %s1177_s24 }
  0x1c   : > { %568 = vrot.lane.b32.xlu1 %v238_v3, %s1177_s24 }
  0x20   : > { %735 = vrot.lane.b32.xlu1 %v1030_v1, %s1178_s25 }
  0x24   : > { %733 = vrot.lane.b32.xlu1 %v238_v3, %s1178_s25 }
  0x86   : > { %v403_v11 = vpop.permute.xlu1 %402 }
  0x8a   : > { %v571_v12 = vpop.permute.xlu1 %570 }
  0x8e   : > { %v569_v15 = vpop.permute.xlu1 %568 }
  0x92   : > { %v736_v16 = vpop.permute.xlu1 %735 }
  0x96   : > { %v734_v17 = vpop.permute.xlu1 %733 }
  0xe8   : > { %v314_v4 = vpop.f32.mrb[0].mxu0 }
  0xe9   : > { %v1066_v5 = vpop.f32.mrb[1].mxu0  ;;  %v318_v6 = vsel %vm241_vm1, %v314_v4, -inf }
  0xea   : > { %319 = vmax.xlane.f32.xlu0 %v318_v6 }
 0x100   : > { %404 = vrot.lane.b32.xlu0 %v1030_v1, %s1176_s23 }
 0x177   : > { %v320_v8 = vpop.xlane.xlu0 %319 }
 0x178   : > { %v321_v9 = vsub.f32 %v314_v4, %v320_v8 }
 0x17a   : > { %v322_v10 = vmul.f32 1.442695, %v321_v9 }
 0x17b   : > { %v405_v13 = vpop.permute.xlu0 %404 }
 0x17c   : > { %1134 = vpow2.f32 %v322_v10 }
 0x186   : > { %v1253_v14 = vpop.eup %1134 }
 0x187   : > { %1070 = vmatmul.mubr.msk.f32.vlgmr.msra.gmra.mrb[0].mxu1 %vm241_vm1, %v1253_v14  ;;  %v324_v47 = vsel %vm241_vm1, %v1253_v14, 0.0 }
 0x188   : > { %1073 = vmatpush3.xpose.msk.msra.mxu1 %vm241_vm1, %v405_v13  ;;  %1074 = vmatprep.mubr.msk.f32.mxu1 %vm1175_vm0, %v1174_v0 }
 0x189   : > { %1082 = vmatprep.subr.mxu1 %v1174_v0 }
 0x18b   : > { %1075 = vmatmul.mubr.msk.f32.vlgmr.msra.gmra.mrb[2].mxu1 %vm241_vm1, %v403_v11 }
 0x18c   : > { %1083 = vmatpush3.xpose.msk.msra.mxu1 %vm241_vm1, %v571_v12  ;;  %1084 = vmatprep.mubr.msk.f32.mxu1 %vm1175_vm0, %v1174_v0 }
 0x18d   : > { %1092 = vmatprep.subr.mxu1 %v1174_v0 }
 0x18f   : > { %1085 = vmatmul.mubr.msk.f32.vlgmr.msra.gmra.mrb[4].mxu1 %vm241_vm1, %v569_v15 }
 0x190   : > { %1093 = vmatpush3.xpose.msk.msra.mxu1 %vm241_vm1, %v736_v16  ;;  %1094 = vmatprep.mubr.msk.f32.mxu1 %vm1175_vm0, %v1174_v0 }
 0x193   : > { %1095 = vmatmul.mubr.msk.f32.vlgmr.msra.gmra.mrb[6].mxu1 %vm241_vm1, %v734_v17 }
 0x25a   : > { %v1271_v18 = vpop.f32.mrb[0].mxu1 }
 0x25b   : > { %v1071_v19 = vpop.f32.mrb[1].mxu1 }
 0x25e   : > { %v476_v20 = vpop.f32.mrb[2].mxu1 }
 0x25f   : > { %v1076_v21 = vpop.f32.mrb[3].mxu1  ;;  %v480_v22 = vsel %vm241_vm1, %v476_v20, -inf }
 0x260   : > { %481 = vmax.xlane.f32.xlu1 %v480_v22 }
 0x262   : > { %v642_v23 = vpop.f32.mrb[4].mxu1 }
 0x263   : > { %v646_v24 = vsel %vm241_vm1, %v642_v23, -inf  ;;  %v1086_v25 = vpop.f32.mrb[5].mxu1 }
 0x264   : > { %647 = vmax.xlane.f32.xlu0 %v646_v24 }
 0x266   : > { %v807_v26 = vpop.f32.mrb[6].mxu1 }
 0x267   : > { %v1096_v27 = vpop.f32.mrb[7].mxu1  ;;  %v811_v28 = vsel %vm241_vm1, %v807_v26, -inf }
 0x271   : > { %655 = vrot.lane.b32.xlu1 %v1031_v7, %s1177_s24 }
 0x27a   : > { %490 = vrot.lane.b32.xlu0 %v1031_v7, %s1176_s23 }
 0x295   : > { %812 = vmax.xlane.f32.xlu1 %v811_v28 }
 0x2a6   : > { %820 = vrot.lane.b32.xlu1 %v1031_v7, %s1178_s25 }
 0x2ed   : > { %v482_v29 = vpop.xlane.xlu1 %481 }
 0x2ee   : > { %v483_v30 = vsub.f32 %v476_v20, %v482_v29 }
 0x2f0   : > { %v484_v31 = vmul.f32 1.442695, %v483_v30 }
 0x2f1   : > { %v648_v32 = vpop.xlane.xlu0 %647  ;;  %v656_v37 = vpop.permute.xlu1 %655 }
 0x2f2   : > { %1136 = vpow2.f32 %v484_v31  ;;  %v649_v33 = vsub.f32 %v642_v23, %v648_v32 }
 0x2f4   : > { %v650_v34 = vmul.f32 1.442695, %v649_v33 }
 0x2f5   : > { %v491_v35 = vpop.permute.xlu0 %490 }
 0x2f6   : > { %1138 = vpow2.f32 %v650_v34  ;;  %1078 = vmatpush3.msra.mxu0 %v491_v35 }
 0x2f7   : > { %1087 = vmatprep.subr.mxu0 %v1174_v0 }
 0x2fc   : > { %v1137_v36 = vpop.eup %1136 }
 0x2fd   : > { %1080 = vmatmul.mubr.msk.f32.vlgmr.msra.gmra.mrb[2].mxu0 %vm241_vm1, %v1137_v36  ;;  %v486_v38 = vsel %vm241_vm1, %v1137_v36, 0.0 }
 0x2fe   : > { %1088 = vmatpush3.msra.mxu0 %v656_v37  ;;  %487 = vadd.xlane.f32.xlu0 %v486_v38 }
 0x2ff   : > { %1089 = vmatprep.mubr.msk.f32.mxu0 %vm1175_vm0, %v1174_v0  ;;  %1097 = vmatprep.subr.mxu0 %v1174_v0 }
 0x300   : > { %v1139_v39 = vpop.eup %1138 }
 0x301   : > { %1090 = vmatmul.mubr.msk.f32.vlgmr.msra.gmra.mrb[4].mxu0 %vm241_vm1, %v1139_v39  ;;  %v652_v40 = vsel %vm241_vm1, %v1139_v39, 0.0 }
 0x302   : > { %653 = vadd.xlane.f32.xlu1 %v652_v40  ;;  %1099 = vmatprep.mubr.msk.f32.mxu0 %vm1175_vm0, %v1174_v0 }
 0x322   : > { %v813_v41 = vpop.xlane.xlu1 %812 }
 0x323   : > { %v814_v42 = vsub.f32 %v807_v26, %v813_v41 }
 0x325   : > { %v815_v43 = vmul.f32 1.442695, %v814_v42 }
 0x326   : > { %v821_v44 = vpop.permute.xlu1 %820 }
 0x327   : > { %1140 = vpow2.f32 %v815_v43  ;;  %1098 = vmatpush3.msra.mxu0 %v821_v44 }
 0x331   : > { %v1141_v45 = vpop.eup %1140 }
 0x332   : > { %1100 = vmatmul.mubr.msk.f32.vlgmr.msra.gmra.mrb[6].mxu0 %vm241_vm1, %v1141_v45  ;;  %v817_v46 = vsel %vm241_vm1, %v1141_v45, 0.0 }
 0x333   : > { %818 = vadd.xlane.f32.xlu0 %v817_v46 }
 0x337   : > { %325 = vadd.xlane.f32.xlu0 %v324_v47 }
 0x38b   : > { %v488_v48 = vpop.xlane.xlu0 %487 }
 0x38c   : > { %1142 = vrcp.f32 %v488_v48 }
 0x38f   : > { %v654_v49 = vpop.xlane.xlu1 %653 }
 0x390   : > { %1144 = vrcp.f32 %v654_v49 }
 0x396   : > { %v1143_v50 = vpop.eup %1142 }
 0x39a   : > { %v1145_v54 = vpop.eup %1144 }
 0x3c0   : > { %v819_v58 = vpop.xlane.xlu0 %818 }
 0x3c1   : > { %1146 = vrcp.f32 %v819_v58 }
 0x3c4   : > { %v326_v63 = vpop.xlane.xlu0 %325 }
 0x3c5   : > { %1148 = vrcp.f32 %v326_v63 }
 0x3cb   : > { %v1147_v59 = vpop.eup %1146 }
 0x3cf   : > { %v1149_v0 = vpop.eup %1148 }
 0x3d0   : > { %v562_v51 = vpop.f32.mrb[2].mxu0  ;;  %v401_v2 = vmul.f32 %v1149_v0, %v1271_v18 }
 0x3d1   : > { %v567_v52 = vmul.f32 %v1143_v50, %v562_v51  ;;  %v1081_v53 = vpop.f32.mrb[3].mxu0 }
 0x3d3   : > { %899 = vrot.lane.b32.xlu1 %v567_v52, %s1179_s29 }
 0x3d4   : > { %v727_v55 = vpop.f32.mrb[4].mxu0 }
 0x3d5   : > { %v732_v56 = vmul.f32 %v1145_v54, %v727_v55  ;;  %v1091_v57 = vpop.f32.mrb[5].mxu0 }
 0x3d7   : > { %903 = vrot.lane.b32.xlu0 %v732_v56, %s1180_s30 }
 0x405   : > { %v892_v60 = vpop.f32.mrb[6].mxu0 }
 0x406   : > { %v897_v61 = vmul.f32 %v1147_v59, %v892_v60  ;;  %v1101_v62 = vpop.f32.mrb[7].mxu0 }
 0x408   : > { %907 = vrot.lane.b32.xlu1 %v897_v61, %s1181_s4 }
 0x445   : > { %v900_v1 = vpop.permute.xlu1 %899 }
 0x446   : > { %v910_v4 = vsel %vm241_vm1, %v401_v2, %v900_v1 }
 0x449   : > { %v904_v3 = vpop.permute.xlu0 %903 }
 0x44a   : > { %v912_v5 = vsel %vm911_vm2, %v910_v4, %v904_v3 }
 0x47a   : > { %v908_v6 = vpop.permute.xlu1 %907 }
 0x47b   : > { %v914_v7 = vsel %vm913_vm3, %v912_v5, %v908_v6 }
 0x47c   : > { %916 = vst.msk [vmem:[%s236_s7] sm:$0xff] %vm915_vm4, %v914_v7 }
 0x47d PF: > { %s13_s14 = sadd.s32 1, %s1172_s14   ;;  %s1312_s12 = smov %s1168_s13 }
 0x47e   : > { %p10_p5 = scmp.ge.s32.totalorder %s13_s14, 4   ;;  %s1313_s13 = smov %s1315_s15 }
 0x480   :  { %12 = sbr.rel (!%p10_p5) target bundleno = 2 (0x2), region = 68 }

// kernel: transformer_block_forward.9
= control target key start
LH: loop header
LB: loop body
LE: loop exit
PB: predicated region body
PF: predicated region fallthrough
CT: control target
= control target key end

     0   :  { %vm22_vm0 = vcmask 261120   ;;  %v275_v5 = vmov 0.0   ;;  %s385_s0 = inlined_call_operand.vmem [shape: f32[16,128], index: 0, kind: input, shape index: {}]   ;;  %s386_s1 = inlined_call_operand.vmem [shape: f32[128,32], index: 1, kind: input, shape index: {}]   ;;  %s387_s2 = inlined_call_operand.vmem [shape: f32[1,32], index: 2, kind: input, shape index: {}]   ;;  %s388_s3 = inlined_call_operand.vmem [shape: f32[16,32], index: 3, kind: input, shape index: {}]   ;;  %s389_s4 = inlined_call_operand.hbm [shape: f32[16,32], index: 4, kind: output, shape index: {}]  }
   0x1   :  { %v29_v0 = vld [vmem:[%s386_s1] sm:$0xff]  ;;  %v30_v1 = vld [vmem:[%s386_s1 + $0x8] sm:$0xff]  ;;  %v31_v2 = vld [vmem:[%s386_s1 + $0x10] sm:$0xff]  ;;  %24 = vst.msk [vmem:[#allocation2 + $0x8] sm:$0xff] %vm22_vm0, %v275_v5 }
   0x2   :  { %v215_v3 = vpack.c.bf16 %v30_v1, %v29_v0  ;;  %v32_v4 = vld [vmem:[%s386_s1 + $0x18] sm:$0xff]  ;;  %23 = vst.msk [vmem:[#allocation2] sm:$0xff] %vm22_vm0, %v275_v5  ;;  %v33_v7 = vld [vmem:[%s386_s1 + $0x20] sm:$0xff]  ;;  %v34_v8 = vld [vmem:[%s386_s1 + $0x28] sm:$0xff] }
   0x3   :  { %v219_v6 = vpack.c.bf16 %v32_v4, %v31_v2  ;;  %v223_v9 = vpack.c.bf16 %v34_v8, %v33_v7  ;;  %v27_v10 = vld [vmem:[%s385_s0] sm:$0xff]  ;;  %v35_v11 = vld [vmem:[%s386_s1 + $0x30] sm:$0xff]  ;;  %v36_v12 = vld [vmem:[%s386_s1 + $0x38] sm:$0xff] }
   0x4   :  { %216 = vmatprep.subr.bf16.mxu0 %v215_v3  ;;  %212 = vmatprep.mubr.f32.mxu0 %v27_v10 }
   0x5   :  { %218 = vmatpush3.bf16.msra.mxu0 %v215_v3 }
   0x6   :  { %220 = vmatprep.subr.bf16.mxu0 %v219_v6 }
   0x7   :  { %9 = vsyncpa [#allocation4], 0  ;;  %v227_v13 = vpack.c.bf16 %v36_v12, %v35_v11  ;;  %v37_v14 = vld [vmem:[%s386_s1 + $0x40] sm:$0xff]  ;;  %v38_v15 = vld [vmem:[%s386_s1 + $0x48] sm:$0xff] }
   0x8   :  { %v231_v16 = vpack.c.bf16 %v38_v15, %v37_v14  ;;  %v39_v17 = vld [vmem:[%s386_s1 + $0x50] sm:$0xff]  ;;  %v40_v18 = vld [vmem:[%s386_s1 + $0x58] sm:$0xff]  ;;  %v41_v20 = vld [vmem:[%s386_s1 + $0x60] sm:$0xff] }
   0x9   :  { %222 = vmatpush3.bf16.msra.mxu0 %v219_v6  ;;  %v235_v19 = vpack.c.bf16 %v40_v18, %v39_v17  ;;  %v42_v21 = vld [vmem:[%s386_s1 + $0x68] sm:$0xff]  ;;  %v43_v23 = vld [vmem:[%s386_s1 + $0x70] sm:$0xff]  ;;  %v44_v24 = vld [vmem:[%s386_s1 + $0x78] sm:$0xff] }
   0xa   :  { %224 = vmatprep.subr.bf16.mxu0 %v223_v9  ;;  %v239_v22 = vpack.c.bf16 %v42_v21, %v41_v20  ;;  %v243_v25 = vpack.c.bf16 %v44_v24, %v43_v23  ;;  %v28_v26 = vld [vmem:[%s385_s0 + $0x8] sm:$0xff]  ;;  %v25_v28 = vld [vmem:[#allocation2] sm:$0xff]  ;;  %s276_s0 = smov [#allocation3]  }
   0xb   :  { %v26_v27 = vld [vmem:[#allocation2 + $0x8] sm:$0xff]  ;;  %v161_v33 = vld [vmem:[%s387_s2] ss:$0 sm:$0xff]  ;;  %s150_s28 = sshll.u32 %s276_s0, 4  ;;  %s151_s28 = int_to_ptr.vmem [resolvable:$true] %s150_s28 }
   0xc   :  { %v140_v35 = vld [vmem:[%s388_s3 + $0x8] sm:$0xff]  ;;  %v139_v38 = vld [vmem:[%s388_s3] sm:$0xff]  ;;  %s251_s2 = scalar_lea.vmem %s151_s28, 256  ;;  %p256_p1 = scmp.lt.s32.totalorder %s151_s28, %s151_s28 }
   0xd   :  { %226 = vmatpush3.bf16.msra.mxu0 %v223_v9  ;;  %p252_p0 = scmp.ne.s32.totalorder %s151_s28, %s251_s2  ;;  %p257_p2 = scmp.lt.s32.totalorder %s251_s2, %s251_s2 }
   0xe   :  { %228 = vmatprep.subr.bf16.mxu0 %v227_v13 }
   0xf   :  { %p258_p3 = por %p257_p2, %p256_p1 }
  0x11   :  { %230 = vmatpush3.bf16.msra.mxu0 %v227_v13  ;;  %p259_p4 = pnand %p258_p3, %p252_p0 }
  0x12   :  { %232 = vmatprep.subr.bf16.mxu0 %v231_v16 }
  0x15   :  { %234 = vmatpush3.bf16.msra.mxu0 %v231_v16 }
  0x16   :  { %236 = vmatprep.subr.bf16.mxu0 %v235_v19 }
  0x19   :  { %238 = vmatpush3.bf16.msra.mxu0 %v235_v19 }
  0x1a   :  { %240 = vmatprep.subr.bf16.mxu0 %v239_v22 }
  0x1d   :  { %242 = vmatpush3.bf16.msra.mxu0 %v239_v22 }
  0x1e   :  { %244 = vmatprep.subr.bf16.mxu0 %v243_v25 }
  0x21   :  { %246 = vmatpush3.bf16.msra.mxu0 %v243_v25 }
  0x24   :  { %213 = vmatmul.mubr.f32.vlgmr.msra.gmra.mrb[0].mxu0 %v28_v26 }
  0xf7   :  { %v214_v29 = vpop.f32.mrb[0].mxu0 }
  0xf8   :  { %v121_v30 = vadd.f32 %v214_v29, %v26_v27  ;;  %v111_v31 = vpop.f32.mrb[1].mxu0 }
  0xf9   :  { %v120_v32 = vadd.f32 %v111_v31, %v25_v28 }
  0xfa   :  { %124 = vst.msk [vmem:[#allocation2 + $0x8] sm:$0xff] %vm22_vm0, %v121_v30 }
  0xfb   :  { %123 = vst.msk [vmem:[#allocation2] sm:$0xff] %vm22_vm0, %v120_v32 }
 0x101   :  { %v129_v34 = vld [vmem:[#allocation2 + $0x8] sm:$0xff] }
 0x102   :  { %v128_v36 = vld [vmem:[#allocation2] sm:$0xff]  ;;  %v138_v37 = vadd.f32 %v161_v33, %v129_v34 }
 0x103   :  { %v137_v39 = vadd.f32 %v161_v33, %v128_v36 }
 0x104   :  { %v142_v40 = vadd.f32 %v140_v35, %v138_v37 }
 0x105   :  { %v141_v41 = vadd.f32 %v139_v38, %v137_v39 }
 0x106   :  { %144 = vst.msk [vmem:[#allocation3 + $0x8] sm:$0xff] %vm22_vm0, %v142_v40 }
 0x107   :  { %143 = vst.msk [vmem:[#allocation3] sm:$0xff] %vm22_vm0, %v141_v41 }
 0x108   :  { %262 = shalt.err (!%p259_p4)
}
 0x109   :  { %s263_s7 = scalar_lea.hbm %s389_s4, 256 }
 0x10a   :  { %p264_p5 = scmp.ne.s32.totalorder %s389_s4, %s263_s7  ;;  %p267_p6 = scmp.lt.u32.totalorder %s263_s7, %s389_s4 }
 0x10c   :  { %p269_p7 = pnand %p267_p6, %p264_p5 }
 0x10e   :  { %272 = shalt.err (!%p269_p7)
}
 0x10f   :  { %s277_s11 = smov 128   ;;  %s278_s12 = smov 8  }
 0x110   :  { %156 = dma.vmem_to_hbm [thread:$0]  %s151_s28, 256, %s389_s4, [#allocation4], %s277_s11, %s277_s11, %s278_s12  }
 0x111   :  { %273 = dma.done.wait [#allocation4], 256  }
 0x112   :  { %274 = vsyncadd [#allocation4], 4294967040 }
 0x113   :  { %160 = vsyncpa [#allocation4], 1 }

</bundles_post_ra>
